<compile_context>
chip_gen: v7x
topology: tpu7x:2x2x1
jax: 0.10.0
libtpu: 0.0.40
codegen_flags: <defaults>
</compile_context>

<pallas_src>
import numpy as np
import jax
import jax.numpy as jnp
from jax.experimental import pallas as pl
from jax.experimental.pallas import tpu as pltpu

KSIZE = 7
PAD = 3


def _make_kernel(n_chan, height, width, b_tile, q, l_pad):
    hw = height * width

    def kernel(x_ref, w_ref, masks_ref, o_ref, sum_ref, max_ref, pad_ref):
        # x_ref:     (b_tile, c_tile, hw)  VMEM, lane-dense last dim
        # w_ref:     (2*7*7,)              SMEM, conv taps
        # masks_ref: (KSIZE, hw)           VMEM, {0,1} column-validity masks
        # o_ref:     (b_tile, 1, hw)       VMEM
        # sum_ref/max_ref: (b_tile, hw) f32 running accumulators over C blocks
        # pad_ref:   (2, l_pad) f32        zero-padded flat pooled maps
        c_step = pl.program_id(1)

        @pl.when(c_step == 0)
        def _init():
            sum_ref[...] = jnp.zeros_like(sum_ref)
            max_ref[...] = jnp.full_like(max_ref, -jnp.inf)

        # Channel-block partial reduction (lane-dense, f32 accumulation).
        for b in range(b_tile):
            xb = x_ref[b].astype(jnp.float32)               # (c_tile, hw)
            sum_ref[b:b + 1, :] = sum_ref[b:b + 1, :] + jnp.sum(
                xb, axis=0, keepdims=True)
            max_ref[b:b + 1, :] = jnp.maximum(
                max_ref[b:b + 1, :], jnp.max(xb, axis=0, keepdims=True))

        @pl.when(c_step == pl.num_programs(1) - 1)
        def _finalize():
            avg = sum_ref[...] * (1.0 / n_chan)             # (b_tile, hw)
            mx = max_ref[...]                               # (b_tile, hw)
            masks = masks_ref[...]                          # (7, hw)

            # Zero once per grid step; the interior is fully overwritten per
            # batch element below, the borders stay zero.
            pad_ref[...] = jnp.zeros_like(pad_ref)

            for b in range(b_tile):
                pad_ref[0:1, q:q + hw] = avg[b:b + 1, :]
                pad_ref[1:2, q:q + hw] = mx[b:b + 1, :]

                acc = jnp.zeros((1, hw), jnp.float32)
                for c in range(2):                          # [avg, max] channels
                    row = pad_ref[c:c + 1, :]               # (1, l_pad)
                    for kw in range(KSIZE):
                        dw = kw - PAD
                        valid = masks[kw:kw + 1, :]         # (1, hw)
                        inner = jnp.zeros((1, hw), jnp.float32)
                        for kh in range(KSIZE):
                            dh = kh - PAD
                            s = dh * width + dw             # flat shift
                            tap = w_ref[c * KSIZE * KSIZE + kh * KSIZE + kw]
                            inner = inner + row[:, q + s:q + s + hw] * tap
                        # mask out column wrap-around once per kw offset
                        acc = acc + inner * valid
                o_ref[b] = jax.nn.sigmoid(acc).astype(o_ref.dtype)

    return kernel


def _pick_c_tile(n_chan, bytes_per_channel, budget_bytes=4 << 20):
    """Largest channel block (divisor of C; multiple of 8 unless == C) in budget."""
    if n_chan * bytes_per_channel <= budget_bytes:
        return n_chan
    cap = max(8, (budget_bytes // bytes_per_channel) // 8 * 8)
    for t in range(int(cap), 7, -8):
        if n_chan % t == 0:
            return t
    return n_chan


def spatial_attention(x, conv_weight, *, b_tile=1, c_tile=None):
    """CBAM SpatialAttention forward. x: (N, C, H, W); conv_weight: (1, 2, 7, 7)."""
    N, C, H, W = x.shape
    HW = H * W
    assert conv_weight.shape == (1, 2, KSIZE, KSIZE)
    assert N % b_tile == 0, "b_tile must divide N"

    if c_tile is None:
        c_tile = _pick_c_tile(C, b_tile * HW * x.dtype.itemsize)
    assert C % c_tile == 0, "c_tile must divide C"
    assert c_tile == C or c_tile % 8 == 0

    # Lane-dense layouts: fold the spatial dims into the lane dimension.
    x_flat = x.reshape(N, C, HW)
    w_flat = conv_weight.reshape(-1).astype(jnp.float32)        # (98,) -> SMEM

    # Column-validity masks: masks[kw, h*W + w] = 1 iff 0 <= w + kw - PAD < W.
    col = np.arange(HW) % W
    masks = np.stack(
        [((col + k - PAD >= 0) & (col + k - PAD < W)) for k in range(KSIZE)]
    ).astype(np.float32)                                        # (7, HW)
    masks = jnp.asarray(masks)

    # Flat zero padding for the 7x7 taps; round up to a lane multiple so the
    # interior store is lane-aligned.
    q = ((PAD * W + PAD + 127) // 128) * 128
    l_pad = HW + 2 * q

    kernel = _make_kernel(C, H, W, b_tile, q, l_pad)
    grid = (N // b_tile, C // c_tile)

    # Explicit VMEM budget: lets blocks grow past the 32 MiB scoped default on
    # v5e/v6e while staying inside v7x's 64 MiB physical VMEM.
    in_block = b_tile * c_tile * HW * x.dtype.itemsize
    out_block = b_tile * HW * x.dtype.itemsize
    scratch = (2 * b_tile * HW + 2 * l_pad) * 4 + int(masks.size) * 4
    vmem_need = 2 * (in_block + out_block) + scratch + (4 << 20)
    vmem_limit = int(min(max(vmem_need, 32 << 20), 64 << 20))

    out_flat = pl.pallas_call(
        kernel,
        out_shape=jax.ShapeDtypeStruct((N, 1, HW), x.dtype),
        grid=grid,
        in_specs=[
            pl.BlockSpec((b_tile, c_tile, HW), lambda b, c: (b, c, 0)),
            pl.BlockSpec(memory_space=pltpu.MemorySpace.SMEM),
            pl.BlockSpec((KSIZE, HW), lambda b, c: (0, 0)),
        ],
        out_specs=pl.BlockSpec((b_tile, 1, HW), lambda b, c: (b, 0, 0)),
        scratch_shapes=[
            pltpu.VMEM((b_tile, HW), jnp.float32),   # running channel sum
            pltpu.VMEM((b_tile, HW), jnp.float32),   # running channel max
            pltpu.VMEM((2, l_pad), jnp.float32),     # zero-padded pooled maps
        ],
        compiler_params=pltpu.CompilerParams(
            dimension_semantics=("parallel", "arbitrary"),
            vmem_limit_bytes=vmem_limit),
    )(x_flat, w_flat, masks)

    return out_flat.reshape(N, 1, H, W)


def spatial_attention_ref(x, conv_weight):
    """Pure-JAX reference mirroring the PyTorch forward."""
    avg = jnp.mean(x, axis=1, keepdims=True)
    mx = jnp.max(x, axis=1, keepdims=True)
    out = jnp.concatenate([avg, mx], axis=1)
    out = jax.lax.conv_general_dilated(
        out, conv_weight, window_strides=(1, 1),
        padding=[(PAD, PAD), (PAD, PAD)],
        dimension_numbers=("NCHW", "OIHW", "NCHW"))
    return jax.nn.sigmoid(out)


if __name__ == "__main__":
    key = jax.random.PRNGKey(0)
    kx, kwt = jax.random.split(key)

    N, C, H, W = 2, 4, 16, 16
    x = jax.random.normal(kx, (N, C, H, W), dtype=jnp.float32)

    # Deterministic conv weight shaped like nn.Conv2d(2, 1, 7, bias=False).
    fan_in = 2 * KSIZE * KSIZE
    bound = 1.0 / np.sqrt(fan_in)
    conv_weight = jax.random.uniform(
        kwt, (1, 2, KSIZE, KSIZE), dtype=jnp.float32,
        minval=-bound, maxval=bound)

    out = spatial_attention(x, conv_weight)
    out = jax.block_until_ready(out)

    ref = spatial_attention_ref(x, conv_weight)
    np.testing.assert_allclose(np.asarray(out), np.asarray(ref),
                               rtol=1e-5, atol=1e-5)
    assert out.shape == (N, 1, H, W)

    print("KERNEL_OK")
</pallas_src>

<mosaic_0001>
module attributes {stable_mosaic.version = 11 : i64} {
  func.func @kernel(%arg0: i32, %arg1: i32, %arg2: memref<1x4x256xf32, #tpu.memory_space<vmem>>, %arg3: memref<98xf32, #tpu.memory_space<smem>>, %arg4: memref<7x256xf32, #tpu.memory_space<vmem>>, %arg5: memref<1x1x256xf32, #tpu.memory_space<vmem>>, %arg6: memref<1x256xf32, #tpu.memory_space<vmem>>, %arg7: memref<1x256xf32, #tpu.memory_space<vmem>>, %arg8: memref<2x512xf32, #tpu.memory_space<vmem>>) attributes {dimension_semantics = [#tpu.dimension_semantics<parallel>, #tpu.dimension_semantics<arbitrary>], iteration_bounds = array<i64: 2, 1>, scalar_prefetch = 0 : i64, scratch_operands = 3 : i64, tpu.core_type = #tpu.core_type<tc>, window_params = [{transform_indices = @transform_0, window_bounds = array<i64: 1, 4, 256>}, {transform_indices = @transform_1, window_bounds = array<i64: 98>}, {pipeline_mode = #tpu.pipeline_mode<synchronous>, transform_indices = @transform_2, window_bounds = array<i64: 7, 256>}, {transform_indices = @transform_3, window_bounds = array<i64: 1, 1, 256>}]} {
    %c0_i32 = arith.constant 0 : i32
    %0 = arith.cmpi eq, %arg1, %c0_i32 : i32
    %1 = arith.extui %0 : i1 to i32
    %c0_i32_0 = arith.constant 0 : i32
    %2 = arith.cmpi ne, %1, %c0_i32_0 : i32
    scf.if %2 {
      %cst_14 = arith.constant 0.000000e+00 : f32
      %18 = vector.broadcast %cst_14 : f32 to vector<1x256xf32>
      %c0_15 = arith.constant 0 : index
      %c0_16 = arith.constant 0 : index
      %19 = vector.load %arg6[%c0_15, %c0_16] : memref<1x256xf32, #tpu.memory_space<vmem>>, vector<1x256xf32>
      tpu.vector_store %arg6[%c0_15, %c0_16], %18 {strides = array<i32>} : memref<1x256xf32, #tpu.memory_space<vmem>>, vector<1x256xf32>,
      %cst_17 = arith.constant 0xFF800000 : f32
      %20 = vector.broadcast %cst_17 : f32 to vector<1x256xf32>
      %c0_18 = arith.constant 0 : index
      %c0_19 = arith.constant 0 : index
      %21 = vector.load %arg7[%c0_18, %c0_19] : memref<1x256xf32, #tpu.memory_space<vmem>>, vector<1x256xf32>
      tpu.vector_store %arg7[%c0_18, %c0_19], %20 {strides = array<i32>} : memref<1x256xf32, #tpu.memory_space<vmem>>, vector<1x256xf32>,
    } else {
    }
    %c0 = arith.constant 0 : index
    %c0_1 = arith.constant 0 : index
    %c0_2 = arith.constant 0 : index
    %3 = vector.load %arg2[%c0, %c0_1, %c0_2] : memref<1x4x256xf32, #tpu.memory_space<vmem>>, vector<1x4x256xf32>
    %4 = vector.shape_cast %3 : vector<1x4x256xf32> to vector<4x256xf32>
    %c0_3 = arith.constant 0 : index
    %c0_4 = arith.constant 0 : index
    %5 = vector.load %arg6[%c0_3, %c0_4] : memref<1x256xf32, #tpu.memory_space<vmem>>, vector<1x256xf32>
    %cst = arith.constant dense<0.000000e+00> : vector<256xf32>
    %6 = vector.multi_reduction <add>, %4, %cst [0] : vector<4x256xf32> to vector<256xf32>
    %7 = vector.shape_cast %6 : vector<256xf32> to vector<1x256xf32>
    %8 = arith.addf %5, %7 : vector<1x256xf32>
    %c0_5 = arith.constant 0 : index
    %c0_6 = arith.constant 0 : index
    %9 = vector.load %arg6[%c0_5, %c0_6] : memref<1x256xf32, #tpu.memory_space<vmem>>, vector<1x256xf32>
    tpu.vector_store %arg6[%c0_5, %c0_6], %8 {strides = array<i32>} : memref<1x256xf32, #tpu.memory_space<vmem>>, vector<1x256xf32>,
    %c0_7 = arith.constant 0 : index
    %c0_8 = arith.constant 0 : index
    %10 = vector.load %arg7[%c0_7, %c0_8] : memref<1x256xf32, #tpu.memory_space<vmem>>, vector<1x256xf32>
    %cst_9 = arith.constant dense<0xFF800000> : vector<256xf32>
    %11 = vector.multi_reduction <maximumf>, %4, %cst_9 [0] : vector<4x256xf32> to vector<256xf32>
    %12 = vector.shape_cast %11 : vector<256xf32> to vector<1x256xf32>
    %13 = arith.maximumf %10, %12 : vector<1x256xf32>
    %c0_10 = arith.constant 0 : index
    %c0_11 = arith.constant 0 : index
    %14 = vector.load %arg7[%c0_10, %c0_11] : memref<1x256xf32, #tpu.memory_space<vmem>>, vector<1x256xf32>
    tpu.vector_store %arg7[%c0_10, %c0_11], %13 {strides = array<i32>} : memref<1x256xf32, #tpu.memory_space<vmem>>, vector<1x256xf32>,
    %c0_i32_12 = arith.constant 0 : i32
    %15 = arith.cmpi eq, %arg1, %c0_i32_12 : i32
    %16 = arith.extui %15 : i1 to i32
    %c0_i32_13 = arith.constant 0 : i32
    %17 = arith.cmpi ne, %16, %c0_i32_13 : i32
    scf.if %17 {
      %c0_14 = arith.constant 0 : index
      %c0_15 = arith.constant 0 : index
      %18 = vector.load %arg6[%c0_14, %c0_15] : memref<1x256xf32, #tpu.memory_space<vmem>>, vector<1x256xf32>
      %cst_16 = arith.constant 2.500000e-01 : f32
      %19 = vector.broadcast %cst_16 : f32 to vector<1x256xf32>
      %20 = arith.mulf %18, %19 : vector<1x256xf32>
      %c0_17 = arith.constant 0 : index
      %c0_18 = arith.constant 0 : index
      %21 = vector.load %arg7[%c0_17, %c0_18] : memref<1x256xf32, #tpu.memory_space<vmem>>, vector<1x256xf32>
      %c0_19 = arith.constant 0 : index
      %c0_20 = arith.constant 0 : index
      %22 = vector.load %arg4[%c0_19, %c0_20] : memref<7x256xf32, #tpu.memory_space<vmem>>, vector<7x256xf32>
      %cst_21 = arith.constant 0.000000e+00 : f32
      %23 = vector.broadcast %cst_21 : f32 to vector<2x512xf32>
      %c0_22 = arith.constant 0 : index
      %c0_23 = arith.constant 0 : index
      %24 = vector.load %arg8[%c0_22, %c0_23] : memref<2x512xf32, #tpu.memory_space<vmem>>, vector<2x512xf32>
      tpu.vector_store %arg8[%c0_22, %c0_23], %23 {strides = array<i32>} : memref<2x512xf32, #tpu.memory_space<vmem>>, vector<2x512xf32>,
      %c0_24 = arith.constant 0 : index
      %c128 = arith.constant 128 : index
      %25 = vector.load %arg8[%c0_24, %c128] : memref<2x512xf32, #tpu.memory_space<vmem>>, vector<1x256xf32>
      tpu.vector_store %arg8[%c0_24, %c128], %20 {strides = array<i32>} : memref<2x512xf32, #tpu.memory_space<vmem>>, vector<1x256xf32>,
      %c1 = arith.constant 1 : index
      %c128_25 = arith.constant 128 : index
      %26 = vector.load %arg8[%c1, %c128_25] : memref<2x512xf32, #tpu.memory_space<vmem>>, vector<1x256xf32>
      tpu.vector_store %arg8[%c1, %c128_25], %21 {strides = array<i32>} : memref<2x512xf32, #tpu.memory_space<vmem>>, vector<1x256xf32>,
      %cst_26 = arith.constant 0.000000e+00 : f32
      %27 = vector.broadcast %cst_26 : f32 to vector<1x256xf32>
      %c0_27 = arith.constant 0 : index
      %c0_28 = arith.constant 0 : index
      %28 = vector.load %arg8[%c0_27, %c0_28] : memref<2x512xf32, #tpu.memory_space<vmem>>, vector<1x512xf32>
      %29 = vector.extract_strided_slice %22 {offsets = [0, 0], sizes = [1, 256], strides = [1, 1]} : vector<7x256xf32> to vector<1x256xf32>
      %cst_29 = arith.constant 0.000000e+00 : f32
      %30 = vector.broadcast %cst_29 : f32 to vector<1x256xf32>
      %c0_30 = arith.constant 0 : index
      %31 = memref.load %arg3[%c0_30] : memref<98xf32, #tpu.memory_space<smem>>
      %32 = vector.extract_strided_slice %28 {offsets = [0, 77], sizes = [1, 256], strides = [1, 1]} : vector<1x512xf32> to vector<1x256xf32>
      %33 = vector.broadcast %31 : f32 to vector<1x256xf32>
      %34 = arith.mulf %32, %33 : vector<1x256xf32>
      %35 = arith.addf %30, %34 : vector<1x256xf32>
      %c7 = arith.constant 7 : index
      %36 = memref.load %arg3[%c7] : memref<98xf32, #tpu.memory_space<smem>>
      %37 = vector.extract_strided_slice %28 {offsets = [0, 93], sizes = [1, 256], strides = [1, 1]} : vector<1x512xf32> to vector<1x256xf32>
      %38 = vector.broadcast %36 : f32 to vector<1x256xf32>
      %39 = arith.mulf %37, %38 : vector<1x256xf32>
      %40 = arith.addf %35, %39 : vector<1x256xf32>
      %c14 = arith.constant 14 : index
      %41 = memref.load %arg3[%c14] : memref<98xf32, #tpu.memory_space<smem>>
      %42 = vector.extract_strided_slice %28 {offsets = [0, 109], sizes = [1, 256], strides = [1, 1]} : vector<1x512xf32> to vector<1x256xf32>
      %43 = vector.broadcast %41 : f32 to vector<1x256xf32>
      %44 = arith.mulf %42, %43 : vector<1x256xf32>
      %45 = arith.addf %40, %44 : vector<1x256xf32>
      %c21 = arith.constant 21 : index
      %46 = memref.load %arg3[%c21] : memref<98xf32, #tpu.memory_space<smem>>
      %47 = vector.extract_strided_slice %28 {offsets = [0, 125], sizes = [1, 256], strides = [1, 1]} : vector<1x512xf32> to vector<1x256xf32>
      %48 = vector.broadcast %46 : f32 to vector<1x256xf32>
      %49 = arith.mulf %47, %48 : vector<1x256xf32>
      %50 = arith.addf %45, %49 : vector<1x256xf32>
      %c28 = arith.constant 28 : index
      %51 = memref.load %arg3[%c28] : memref<98xf32, #tpu.memory_space<smem>>
      %52 = vector.extract_strided_slice %28 {offsets = [0, 141], sizes = [1, 256], strides = [1, 1]} : vector<1x512xf32> to vector<1x256xf32>
      %53 = vector.broadcast %51 : f32 to vector<1x256xf32>
      %54 = arith.mulf %52, %53 : vector<1x256xf32>
      %55 = arith.addf %50, %54 : vector<1x256xf32>
      %c35 = arith.constant 35 : index
      %56 = memref.load %arg3[%c35] : memref<98xf32, #tpu.memory_space<smem>>
      %57 = vector.extract_strided_slice %28 {offsets = [0, 157], sizes = [1, 256], strides = [1, 1]} : vector<1x512xf32> to vector<1x256xf32>
      %58 = vector.broadcast %56 : f32 to vector<1x256xf32>
      %59 = arith.mulf %57, %58 : vector<1x256xf32>
      %60 = arith.addf %55, %59 : vector<1x256xf32>
      %c42 = arith.constant 42 : index
      %61 = memref.load %arg3[%c42] : memref<98xf32, #tpu.memory_space<smem>>
      %62 = vector.extract_strided_slice %28 {offsets = [0, 173], sizes = [1, 256], strides = [1, 1]} : vector<1x512xf32> to vector<1x256xf32>
      %63 = vector.broadcast %61 : f32 to vector<1x256xf32>
      %64 = arith.mulf %62, %63 : vector<1x256xf32>
      %65 = arith.addf %60, %64 : vector<1x256xf32>
      %66 = arith.mulf %65, %29 : vector<1x256xf32>
      %67 = arith.addf %27, %66 : vector<1x256xf32>
      %68 = vector.extract_strided_slice %22 {offsets = [1, 0], sizes = [1, 256], strides = [1, 1]} : vector<7x256xf32> to vector<1x256xf32>
      %cst_31 = arith.constant 0.000000e+00 : f32
      %69 = vector.broadcast %cst_31 : f32 to vector<1x256xf32>
      %c1_32 = arith.constant 1 : index
      %70 = memref.load %arg3[%c1_32] : memref<98xf32, #tpu.memory_space<smem>>
      %71 = vector.extract_strided_slice %28 {offsets = [0, 78], sizes = [1, 256], strides = [1, 1]} : vector<1x512xf32> to vector<1x256xf32>
      %72 = vector.broadcast %70 : f32 to vector<1x256xf32>
      %73 = arith.mulf %71, %72 : vector<1x256xf32>
      %74 = arith.addf %69, %73 : vector<1x256xf32>
      %c8 = arith.constant 8 : index
      %75 = memref.load %arg3[%c8] : memref<98xf32, #tpu.memory_space<smem>>
      %76 = vector.extract_strided_slice %28 {offsets = [0, 94], sizes = [1, 256], strides = [1, 1]} : vector<1x512xf32> to vector<1x256xf32>
      %77 = vector.broadcast %75 : f32 to vector<1x256xf32>
      %78 = arith.mulf %76, %77 : vector<1x256xf32>
      %79 = arith.addf %74, %78 : vector<1x256xf32>
      %c15 = arith.constant 15 : index
      %80 = memref.load %arg3[%c15] : memref<98xf32, #tpu.memory_space<smem>>
      %81 = vector.extract_strided_slice %28 {offsets = [0, 110], sizes = [1, 256], strides = [1, 1]} : vector<1x512xf32> to vector<1x256xf32>
      %82 = vector.broadcast %80 : f32 to vector<1x256xf32>
      %83 = arith.mulf %81, %82 : vector<1x256xf32>
      %84 = arith.addf %79, %83 : vector<1x256xf32>
      %c22 = arith.constant 22 : index
      %85 = memref.load %arg3[%c22] : memref<98xf32, #tpu.memory_space<smem>>
      %86 = vector.extract_strided_slice %28 {offsets = [0, 126], sizes = [1, 256], strides = [1, 1]} : vector<1x512xf32> to vector<1x256xf32>
      %87 = vector.broadcast %85 : f32 to vector<1x256xf32>
      %88 = arith.mulf %86, %87 : vector<1x256xf32>
      %89 = arith.addf %84, %88 : vector<1x256xf32>
      %c29 = arith.constant 29 : index
      %90 = memref.load %arg3[%c29] : memref<98xf32, #tpu.memory_space<smem>>
      %91 = vector.extract_strided_slice %28 {offsets = [0, 142], sizes = [1, 256], strides = [1, 1]} : vector<1x512xf32> to vector<1x256xf32>
      %92 = vector.broadcast %90 : f32 to vector<1x256xf32>
      %93 = arith.mulf %91, %92 : vector<1x256xf32>
      %94 = arith.addf %89, %93 : vector<1x256xf32>
      %c36 = arith.constant 36 : index
      %95 = memref.load %arg3[%c36] : memref<98xf32, #tpu.memory_space<smem>>
      %96 = vector.extract_strided_slice %28 {offsets = [0, 158], sizes = [1, 256], strides = [1, 1]} : vector<1x512xf32> to vector<1x256xf32>
      %97 = vector.broadcast %95 : f32 to vector<1x256xf32>
      %98 = arith.mulf %96, %97 : vector<1x256xf32>
      %99 = arith.addf %94, %98 : vector<1x256xf32>
      %c43 = arith.constant 43 : index
      %100 = memref.load %arg3[%c43] : memref<98xf32, #tpu.memory_space<smem>>
      %101 = vector.extract_strided_slice %28 {offsets = [0, 174], sizes = [1, 256], strides = [1, 1]} : vector<1x512xf32> to vector<1x256xf32>
      %102 = vector.broadcast %100 : f32 to vector<1x256xf32>
      %103 = arith.mulf %101, %102 : vector<1x256xf32>
      %104 = arith.addf %99, %103 : vector<1x256xf32>
      %105 = arith.mulf %104, %68 : vector<1x256xf32>
      %106 = arith.addf %67, %105 : vector<1x256xf32>
      %107 = vector.extract_strided_slice %22 {offsets = [2, 0], sizes = [1, 256], strides = [1, 1]} : vector<7x256xf32> to vector<1x256xf32>
      %cst_33 = arith.constant 0.000000e+00 : f32
      %108 = vector.broadcast %cst_33 : f32 to vector<1x256xf32>
      %c2 = arith.constant 2 : index
      %109 = memref.load %arg3[%c2] : memref<98xf32, #tpu.memory_space<smem>>
      %110 = vector.extract_strided_slice %28 {offsets = [0, 79], sizes = [1, 256], strides = [1, 1]} : vector<1x512xf32> to vector<1x256xf32>
      %111 = vector.broadcast %109 : f32 to vector<1x256xf32>
      %112 = arith.mulf %110, %111 : vector<1x256xf32>
      %113 = arith.addf %108, %112 : vector<1x256xf32>
      %c9 = arith.constant 9 : index
      %114 = memref.load %arg3[%c9] : memref<98xf32, #tpu.memory_space<smem>>
      %115 = vector.extract_strided_slice %28 {offsets = [0, 95], sizes = [1, 256], strides = [1, 1]} : vector<1x512xf32> to vector<1x256xf32>
      %116 = vector.broadcast %114 : f32 to vector<1x256xf32>
      %117 = arith.mulf %115, %116 : vector<1x256xf32>
      %118 = arith.addf %113, %117 : vector<1x256xf32>
      %c16 = arith.constant 16 : index
      %119 = memref.load %arg3[%c16] : memref<98xf32, #tpu.memory_space<smem>>
      %120 = vector.extract_strided_slice %28 {offsets = [0, 111], sizes = [1, 256], strides = [1, 1]} : vector<1x512xf32> to vector<1x256xf32>
      %121 = vector.broadcast %119 : f32 to vector<1x256xf32>
      %122 = arith.mulf %120, %121 : vector<1x256xf32>
      %123 = arith.addf %118, %122 : vector<1x256xf32>
      %c23 = arith.constant 23 : index
      %124 = memref.load %arg3[%c23] : memref<98xf32, #tpu.memory_space<smem>>
      %125 = vector.extract_strided_slice %28 {offsets = [0, 127], sizes = [1, 256], strides = [1, 1]} : vector<1x512xf32> to vector<1x256xf32>
      %126 = vector.broadcast %124 : f32 to vector<1x256xf32>
      %127 = arith.mulf %125, %126 : vector<1x256xf32>
      %128 = arith.addf %123, %127 : vector<1x256xf32>
      %c30 = arith.constant 30 : index
      %129 = memref.load %arg3[%c30] : memref<98xf32, #tpu.memory_space<smem>>
      %130 = vector.extract_strided_slice %28 {offsets = [0, 143], sizes = [1, 256], strides = [1, 1]} : vector<1x512xf32> to vector<1x256xf32>
      %131 = vector.broadcast %129 : f32 to vector<1x256xf32>
      %132 = arith.mulf %130, %131 : vector<1x256xf32>
      %133 = arith.addf %128, %132 : vector<1x256xf32>
      %c37 = arith.constant 37 : index
      %134 = memref.load %arg3[%c37] : memref<98xf32, #tpu.memory_space<smem>>
      %135 = vector.extract_strided_slice %28 {offsets = [0, 159], sizes = [1, 256], strides = [1, 1]} : vector<1x512xf32> to vector<1x256xf32>
      %136 = vector.broadcast %134 : f32 to vector<1x256xf32>
      %137 = arith.mulf %135, %136 : vector<1x256xf32>
      %138 = arith.addf %133, %137 : vector<1x256xf32>
      %c44 = arith.constant 44 : index
      %139 = memref.load %arg3[%c44] : memref<98xf32, #tpu.memory_space<smem>>
      %140 = vector.extract_strided_slice %28 {offsets = [0, 175], sizes = [1, 256], strides = [1, 1]} : vector<1x512xf32> to vector<1x256xf32>
      %141 = vector.broadcast %139 : f32 to vector<1x256xf32>
      %142 = arith.mulf %140, %141 : vector<1x256xf32>
      %143 = arith.addf %138, %142 : vector<1x256xf32>
      %144 = arith.mulf %143, %107 : vector<1x256xf32>
      %145 = arith.addf %106, %144 : vector<1x256xf32>
      %146 = vector.extract_strided_slice %22 {offsets = [3, 0], sizes = [1, 256], strides = [1, 1]} : vector<7x256xf32> to vector<1x256xf32>
      %cst_34 = arith.constant 0.000000e+00 : f32
      %147 = vector.broadcast %cst_34 : f32 to vector<1x256xf32>
      %c3 = arith.constant 3 : index
      %148 = memref.load %arg3[%c3] : memref<98xf32, #tpu.memory_space<smem>>
      %149 = vector.extract_strided_slice %28 {offsets = [0, 80], sizes = [1, 256], strides = [1, 1]} : vector<1x512xf32> to vector<1x256xf32>
      %150 = vector.broadcast %148 : f32 to vector<1x256xf32>
      %151 = arith.mulf %149, %150 : vector<1x256xf32>
      %152 = arith.addf %147, %151 : vector<1x256xf32>
      %c10 = arith.constant 10 : index
      %153 = memref.load %arg3[%c10] : memref<98xf32, #tpu.memory_space<smem>>
      %154 = vector.extract_strided_slice %28 {offsets = [0, 96], sizes = [1, 256], strides = [1, 1]} : vector<1x512xf32> to vector<1x256xf32>
      %155 = vector.broadcast %153 : f32 to vector<1x256xf32>
      %156 = arith.mulf %154, %155 : vector<1x256xf32>
      %157 = arith.addf %152, %156 : vector<1x256xf32>
      %c17 = arith.constant 17 : index
      %158 = memref.load %arg3[%c17] : memref<98xf32, #tpu.memory_space<smem>>
      %159 = vector.extract_strided_slice %28 {offsets = [0, 112], sizes = [1, 256], strides = [1, 1]} : vector<1x512xf32> to vector<1x256xf32>
      %160 = vector.broadcast %158 : f32 to vector<1x256xf32>
      %161 = arith.mulf %159, %160 : vector<1x256xf32>
      %162 = arith.addf %157, %161 : vector<1x256xf32>
      %c24 = arith.constant 24 : index
      %163 = memref.load %arg3[%c24] : memref<98xf32, #tpu.memory_space<smem>>
      %164 = vector.extract_strided_slice %28 {offsets = [0, 128], sizes = [1, 256], strides = [1, 1]} : vector<1x512xf32> to vector<1x256xf32>
      %165 = vector.broadcast %163 : f32 to vector<1x256xf32>
      %166 = arith.mulf %164, %165 : vector<1x256xf32>
      %167 = arith.addf %162, %166 : vector<1x256xf32>
      %c31 = arith.constant 31 : index
      %168 = memref.load %arg3[%c31] : memref<98xf32, #tpu.memory_space<smem>>
      %169 = vector.extract_strided_slice %28 {offsets = [0, 144], sizes = [1, 256], strides = [1, 1]} : vector<1x512xf32> to vector<1x256xf32>
      %170 = vector.broadcast %168 : f32 to vector<1x256xf32>
      %171 = arith.mulf %169, %170 : vector<1x256xf32>
      %172 = arith.addf %167, %171 : vector<1x256xf32>
      %c38 = arith.constant 38 : index
      %173 = memref.load %arg3[%c38] : memref<98xf32, #tpu.memory_space<smem>>
      %174 = vector.extract_strided_slice %28 {offsets = [0, 160], sizes = [1, 256], strides = [1, 1]} : vector<1x512xf32> to vector<1x256xf32>
      %175 = vector.broadcast %173 : f32 to vector<1x256xf32>
      %176 = arith.mulf %174, %175 : vector<1x256xf32>
      %177 = arith.addf %172, %176 : vector<1x256xf32>
      %c45 = arith.constant 45 : index
      %178 = memref.load %arg3[%c45] : memref<98xf32, #tpu.memory_space<smem>>
      %179 = vector.extract_strided_slice %28 {offsets = [0, 176], sizes = [1, 256], strides = [1, 1]} : vector<1x512xf32> to vector<1x256xf32>
      %180 = vector.broadcast %178 : f32 to vector<1x256xf32>
      %181 = arith.mulf %179, %180 : vector<1x256xf32>
      %182 = arith.addf %177, %181 : vector<1x256xf32>
      %183 = arith.mulf %182, %146 : vector<1x256xf32>
      %184 = arith.addf %145, %183 : vector<1x256xf32>
      %185 = vector.extract_strided_slice %22 {offsets = [4, 0], sizes = [1, 256], strides = [1, 1]} : vector<7x256xf32> to vector<1x256xf32>
      %cst_35 = arith.constant 0.000000e+00 : f32
      %186 = vector.broadcast %cst_35 : f32 to vector<1x256xf32>
      %c4 = arith.constant 4 : index
      %187 = memref.load %arg3[%c4] : memref<98xf32, #tpu.memory_space<smem>>
      %188 = vector.extract_strided_slice %28 {offsets = [0, 81], sizes = [1, 256], strides = [1, 1]} : vector<1x512xf32> to vector<1x256xf32>
      %189 = vector.broadcast %187 : f32 to vector<1x256xf32>
      %190 = arith.mulf %188, %189 : vector<1x256xf32>
      %191 = arith.addf %186, %190 : vector<1x256xf32>
      %c11 = arith.constant 11 : index
      %192 = memref.load %arg3[%c11] : memref<98xf32, #tpu.memory_space<smem>>
      %193 = vector.extract_strided_slice %28 {offsets = [0, 97], sizes = [1, 256], strides = [1, 1]} : vector<1x512xf32> to vector<1x256xf32>
      %194 = vector.broadcast %192 : f32 to vector<1x256xf32>
      %195 = arith.mulf %193, %194 : vector<1x256xf32>
      %196 = arith.addf %191, %195 : vector<1x256xf32>
      %c18 = arith.constant 18 : index
      %197 = memref.load %arg3[%c18] : memref<98xf32, #tpu.memory_space<smem>>
      %198 = vector.extract_strided_slice %28 {offsets = [0, 113], sizes = [1, 256], strides = [1, 1]} : vector<1x512xf32> to vector<1x256xf32>
      %199 = vector.broadcast %197 : f32 to vector<1x256xf32>
      %200 = arith.mulf %198, %199 : vector<1x256xf32>
      %201 = arith.addf %196, %200 : vector<1x256xf32>
      %c25 = arith.constant 25 : index
      %202 = memref.load %arg3[%c25] : memref<98xf32, #tpu.memory_space<smem>>
      %203 = vector.extract_strided_slice %28 {offsets = [0, 129], sizes = [1, 256], strides = [1, 1]} : vector<1x512xf32> to vector<1x256xf32>
      %204 = vector.broadcast %202 : f32 to vector<1x256xf32>
      %205 = arith.mulf %203, %204 : vector<1x256xf32>
      %206 = arith.addf %201, %205 : vector<1x256xf32>
      %c32 = arith.constant 32 : index
      %207 = memref.load %arg3[%c32] : memref<98xf32, #tpu.memory_space<smem>>
      %208 = vector.extract_strided_slice %28 {offsets = [0, 145], sizes = [1, 256], strides = [1, 1]} : vector<1x512xf32> to vector<1x256xf32>
      %209 = vector.broadcast %207 : f32 to vector<1x256xf32>
      %210 = arith.mulf %208, %209 : vector<1x256xf32>
      %211 = arith.addf %206, %210 : vector<1x256xf32>
      %c39 = arith.constant 39 : index
      %212 = memref.load %arg3[%c39] : memref<98xf32, #tpu.memory_space<smem>>
      %213 = vector.extract_strided_slice %28 {offsets = [0, 161], sizes = [1, 256], strides = [1, 1]} : vector<1x512xf32> to vector<1x256xf32>
      %214 = vector.broadcast %212 : f32 to vector<1x256xf32>
      %215 = arith.mulf %213, %214 : vector<1x256xf32>
      %216 = arith.addf %211, %215 : vector<1x256xf32>
      %c46 = arith.constant 46 : index
      %217 = memref.load %arg3[%c46] : memref<98xf32, #tpu.memory_space<smem>>
      %218 = vector.extract_strided_slice %28 {offsets = [0, 177], sizes = [1, 256], strides = [1, 1]} : vector<1x512xf32> to vector<1x256xf32>
      %219 = vector.broadcast %217 : f32 to vector<1x256xf32>
      %220 = arith.mulf %218, %219 : vector<1x256xf32>
      %221 = arith.addf %216, %220 : vector<1x256xf32>
      %222 = arith.mulf %221, %185 : vector<1x256xf32>
      %223 = arith.addf %184, %222 : vector<1x256xf32>
      %224 = vector.extract_strided_slice %22 {offsets = [5, 0], sizes = [1, 256], strides = [1, 1]} : vector<7x256xf32> to vector<1x256xf32>
      %cst_36 = arith.constant 0.000000e+00 : f32
      %225 = vector.broadcast %cst_36 : f32 to vector<1x256xf32>
      %c5 = arith.constant 5 : index
      %226 = memref.load %arg3[%c5] : memref<98xf32, #tpu.memory_space<smem>>
      %227 = vector.extract_strided_slice %28 {offsets = [0, 82], sizes = [1, 256], strides = [1, 1]} : vector<1x512xf32> to vector<1x256xf32>
      %228 = vector.broadcast %226 : f32 to vector<1x256xf32>
      %229 = arith.mulf %227, %228 : vector<1x256xf32>
      %230 = arith.addf %225, %229 : vector<1x256xf32>
      %c12 = arith.constant 12 : index
      %231 = memref.load %arg3[%c12] : memref<98xf32, #tpu.memory_space<smem>>
      %232 = vector.extract_strided_slice %28 {offsets = [0, 98], sizes = [1, 256], strides = [1, 1]} : vector<1x512xf32> to vector<1x256xf32>
      %233 = vector.broadcast %231 : f32 to vector<1x256xf32>
      %234 = arith.mulf %232, %233 : vector<1x256xf32>
      %235 = arith.addf %230, %234 : vector<1x256xf32>
      %c19 = arith.constant 19 : index
      %236 = memref.load %arg3[%c19] : memref<98xf32, #tpu.memory_space<smem>>
      %237 = vector.extract_strided_slice %28 {offsets = [0, 114], sizes = [1, 256], strides = [1, 1]} : vector<1x512xf32> to vector<1x256xf32>
      %238 = vector.broadcast %236 : f32 to vector<1x256xf32>
      %239 = arith.mulf %237, %238 : vector<1x256xf32>
      %240 = arith.addf %235, %239 : vector<1x256xf32>
      %c26 = arith.constant 26 : index
      %241 = memref.load %arg3[%c26] : memref<98xf32, #tpu.memory_space<smem>>
      %242 = vector.extract_strided_slice %28 {offsets = [0, 130], sizes = [1, 256], strides = [1, 1]} : vector<1x512xf32> to vector<1x256xf32>
      %243 = vector.broadcast %241 : f32 to vector<1x256xf32>
      %244 = arith.mulf %242, %243 : vector<1x256xf32>
      %245 = arith.addf %240, %244 : vector<1x256xf32>
      %c33 = arith.constant 33 : index
      %246 = memref.load %arg3[%c33] : memref<98xf32, #tpu.memory_space<smem>>
      %247 = vector.extract_strided_slice %28 {offsets = [0, 146], sizes = [1, 256], strides = [1, 1]} : vector<1x512xf32> to vector<1x256xf32>
      %248 = vector.broadcast %246 : f32 to vector<1x256xf32>
      %249 = arith.mulf %247, %248 : vector<1x256xf32>
      %250 = arith.addf %245, %249 : vector<1x256xf32>
      %c40 = arith.constant 40 : index
      %251 = memref.load %arg3[%c40] : memref<98xf32, #tpu.memory_space<smem>>
      %252 = vector.extract_strided_slice %28 {offsets = [0, 162], sizes = [1, 256], strides = [1, 1]} : vector<1x512xf32> to vector<1x256xf32>
      %253 = vector.broadcast %251 : f32 to vector<1x256xf32>
      %254 = arith.mulf %252, %253 : vector<1x256xf32>
      %255 = arith.addf %250, %254 : vector<1x256xf32>
      %c47 = arith.constant 47 : index
      %256 = memref.load %arg3[%c47] : memref<98xf32, #tpu.memory_space<smem>>
      %257 = vector.extract_strided_slice %28 {offsets = [0, 178], sizes = [1, 256], strides = [1, 1]} : vector<1x512xf32> to vector<1x256xf32>
      %258 = vector.broadcast %256 : f32 to vector<1x256xf32>
      %259 = arith.mulf %257, %258 : vector<1x256xf32>
      %260 = arith.addf %255, %259 : vector<1x256xf32>
      %261 = arith.mulf %260, %224 : vector<1x256xf32>
      %262 = arith.addf %223, %261 : vector<1x256xf32>
      %263 = vector.extract_strided_slice %22 {offsets = [6, 0], sizes = [1, 256], strides = [1, 1]} : vector<7x256xf32> to vector<1x256xf32>
      %cst_37 = arith.constant 0.000000e+00 : f32
      %264 = vector.broadcast %cst_37 : f32 to vector<1x256xf32>
      %c6 = arith.constant 6 : index
      %265 = memref.load %arg3[%c6] : memref<98xf32, #tpu.memory_space<smem>>
      %266 = vector.extract_strided_slice %28 {offsets = [0, 83], sizes = [1, 256], strides = [1, 1]} : vector<1x512xf32> to vector<1x256xf32>
      %267 = vector.broadcast %265 : f32 to vector<1x256xf32>
      %268 = arith.mulf %266, %267 : vector<1x256xf32>
      %269 = arith.addf %264, %268 : vector<1x256xf32>
      %c13 = arith.constant 13 : index
      %270 = memref.load %arg3[%c13] : memref<98xf32, #tpu.memory_space<smem>>
      %271 = vector.extract_strided_slice %28 {offsets = [0, 99], sizes = [1, 256], strides = [1, 1]} : vector<1x512xf32> to vector<1x256xf32>
      %272 = vector.broadcast %270 : f32 to vector<1x256xf32>
      %273 = arith.mulf %271, %272 : vector<1x256xf32>
      %274 = arith.addf %269, %273 : vector<1x256xf32>
      %c20 = arith.constant 20 : index
      %275 = memref.load %arg3[%c20] : memref<98xf32, #tpu.memory_space<smem>>
      %276 = vector.extract_strided_slice %28 {offsets = [0, 115], sizes = [1, 256], strides = [1, 1]} : vector<1x512xf32> to vector<1x256xf32>
      %277 = vector.broadcast %275 : f32 to vector<1x256xf32>
      %278 = arith.mulf %276, %277 : vector<1x256xf32>
      %279 = arith.addf %274, %278 : vector<1x256xf32>
      %c27 = arith.constant 27 : index
      %280 = memref.load %arg3[%c27] : memref<98xf32, #tpu.memory_space<smem>>
      %281 = vector.extract_strided_slice %28 {offsets = [0, 131], sizes = [1, 256], strides = [1, 1]} : vector<1x512xf32> to vector<1x256xf32>
      %282 = vector.broadcast %280 : f32 to vector<1x256xf32>
      %283 = arith.mulf %281, %282 : vector<1x256xf32>
      %284 = arith.addf %279, %283 : vector<1x256xf32>
      %c34 = arith.constant 34 : index
      %285 = memref.load %arg3[%c34] : memref<98xf32, #tpu.memory_space<smem>>
      %286 = vector.extract_strided_slice %28 {offsets = [0, 147], sizes = [1, 256], strides = [1, 1]} : vector<1x512xf32> to vector<1x256xf32>
      %287 = vector.broadcast %285 : f32 to vector<1x256xf32>
      %288 = arith.mulf %286, %287 : vector<1x256xf32>
      %289 = arith.addf %284, %288 : vector<1x256xf32>
      %c41 = arith.constant 41 : index
      %290 = memref.load %arg3[%c41] : memref<98xf32, #tpu.memory_space<smem>>
      %291 = vector.extract_strided_slice %28 {offsets = [0, 163], sizes = [1, 256], strides = [1, 1]} : vector<1x512xf32> to vector<1x256xf32>
      %292 = vector.broadcast %290 : f32 to vector<1x256xf32>
      %293 = arith.mulf %291, %292 : vector<1x256xf32>
      %294 = arith.addf %289, %293 : vector<1x256xf32>
      %c48 = arith.constant 48 : index
      %295 = memref.load %arg3[%c48] : memref<98xf32, #tpu.memory_space<smem>>
      %296 = vector.extract_strided_slice %28 {offsets = [0, 179], sizes = [1, 256], strides = [1, 1]} : vector<1x512xf32> to vector<1x256xf32>
      %297 = vector.broadcast %295 : f32 to vector<1x256xf32>
      %298 = arith.mulf %296, %297 : vector<1x256xf32>
      %299 = arith.addf %294, %298 : vector<1x256xf32>
      %300 = arith.mulf %299, %263 : vector<1x256xf32>
      %301 = arith.addf %262, %300 : vector<1x256xf32>
      %c1_38 = arith.constant 1 : index
      %c0_39 = arith.constant 0 : index
      %302 = vector.load %arg8[%c1_38, %c0_39] : memref<2x512xf32, #tpu.memory_space<vmem>>, vector<1x512xf32>
      %303 = vector.extract_strided_slice %22 {offsets = [0, 0], sizes = [1, 256], strides = [1, 1]} : vector<7x256xf32> to vector<1x256xf32>
      %cst_40 = arith.constant 0.000000e+00 : f32
      %304 = vector.broadcast %cst_40 : f32 to vector<1x256xf32>
      %c49 = arith.constant 49 : index
      %305 = memref.load %arg3[%c49] : memref<98xf32, #tpu.memory_space<smem>>
      %306 = vector.extract_strided_slice %302 {offsets = [0, 77], sizes = [1, 256], strides = [1, 1]} : vector<1x512xf32> to vector<1x256xf32>
      %307 = vector.broadcast %305 : f32 to vector<1x256xf32>
      %308 = arith.mulf %306, %307 : vector<1x256xf32>
      %309 = arith.addf %304, %308 : vector<1x256xf32>
      %c56 = arith.constant 56 : index
      %310 = memref.load %arg3[%c56] : memref<98xf32, #tpu.memory_space<smem>>
      %311 = vector.extract_strided_slice %302 {offsets = [0, 93], sizes = [1, 256], strides = [1, 1]} : vector<1x512xf32> to vector<1x256xf32>
      %312 = vector.broadcast %310 : f32 to vector<1x256xf32>
      %313 = arith.mulf %311, %312 : vector<1x256xf32>
      %314 = arith.addf %309, %313 : vector<1x256xf32>
      %c63 = arith.constant 63 : index
      %315 = memref.load %arg3[%c63] : memref<98xf32, #tpu.memory_space<smem>>
      %316 = vector.extract_strided_slice %302 {offsets = [0, 109], sizes = [1, 256], strides = [1, 1]} : vector<1x512xf32> to vector<1x256xf32>
      %317 = vector.broadcast %315 : f32 to vector<1x256xf32>
      %318 = arith.mulf %316, %317 : vector<1x256xf32>
      %319 = arith.addf %314, %318 : vector<1x256xf32>
      %c70 = arith.constant 70 : index
      %320 = memref.load %arg3[%c70] : memref<98xf32, #tpu.memory_space<smem>>
      %321 = vector.extract_strided_slice %302 {offsets = [0, 125], sizes = [1, 256], strides = [1, 1]} : vector<1x512xf32> to vector<1x256xf32>
      %322 = vector.broadcast %320 : f32 to vector<1x256xf32>
      %323 = arith.mulf %321, %322 : vector<1x256xf32>
      %324 = arith.addf %319, %323 : vector<1x256xf32>
      %c77 = arith.constant 77 : index
      %325 = memref.load %arg3[%c77] : memref<98xf32, #tpu.memory_space<smem>>
      %326 = vector.extract_strided_slice %302 {offsets = [0, 141], sizes = [1, 256], strides = [1, 1]} : vector<1x512xf32> to vector<1x256xf32>
      %327 = vector.broadcast %325 : f32 to vector<1x256xf32>
      %328 = arith.mulf %326, %327 : vector<1x256xf32>
      %329 = arith.addf %324, %328 : vector<1x256xf32>
      %c84 = arith.constant 84 : index
      %330 = memref.load %arg3[%c84] : memref<98xf32, #tpu.memory_space<smem>>
      %331 = vector.extract_strided_slice %302 {offsets = [0, 157], sizes = [1, 256], strides = [1, 1]} : vector<1x512xf32> to vector<1x256xf32>
      %332 = vector.broadcast %330 : f32 to vector<1x256xf32>
      %333 = arith.mulf %331, %332 : vector<1x256xf32>
      %334 = arith.addf %329, %333 : vector<1x256xf32>
      %c91 = arith.constant 91 : index
      %335 = memref.load %arg3[%c91] : memref<98xf32, #tpu.memory_space<smem>>
      %336 = vector.extract_strided_slice %302 {offsets = [0, 173], sizes = [1, 256], strides = [1, 1]} : vector<1x512xf32> to vector<1x256xf32>
      %337 = vector.broadcast %335 : f32 to vector<1x256xf32>
      %338 = arith.mulf %336, %337 : vector<1x256xf32>
      %339 = arith.addf %334, %338 : vector<1x256xf32>
      %340 = arith.mulf %339, %303 : vector<1x256xf32>
      %341 = arith.addf %301, %340 : vector<1x256xf32>
      %342 = vector.extract_strided_slice %22 {offsets = [1, 0], sizes = [1, 256], strides = [1, 1]} : vector<7x256xf32> to vector<1x256xf32>
      %cst_41 = arith.constant 0.000000e+00 : f32
      %343 = vector.broadcast %cst_41 : f32 to vector<1x256xf32>
      %c50 = arith.constant 50 : index
      %344 = memref.load %arg3[%c50] : memref<98xf32, #tpu.memory_space<smem>>
      %345 = vector.extract_strided_slice %302 {offsets = [0, 78], sizes = [1, 256], strides = [1, 1]} : vector<1x512xf32> to vector<1x256xf32>
      %346 = vector.broadcast %344 : f32 to vector<1x256xf32>
      %347 = arith.mulf %345, %346 : vector<1x256xf32>
      %348 = arith.addf %343, %347 : vector<1x256xf32>
      %c57 = arith.constant 57 : index
      %349 = memref.load %arg3[%c57] : memref<98xf32, #tpu.memory_space<smem>>
      %350 = vector.extract_strided_slice %302 {offsets = [0, 94], sizes = [1, 256], strides = [1, 1]} : vector<1x512xf32> to vector<1x256xf32>
      %351 = vector.broadcast %349 : f32 to vector<1x256xf32>
      %352 = arith.mulf %350, %351 : vector<1x256xf32>
      %353 = arith.addf %348, %352 : vector<1x256xf32>
      %c64 = arith.constant 64 : index
      %354 = memref.load %arg3[%c64] : memref<98xf32, #tpu.memory_space<smem>>
      %355 = vector.extract_strided_slice %302 {offsets = [0, 110], sizes = [1, 256], strides = [1, 1]} : vector<1x512xf32> to vector<1x256xf32>
      %356 = vector.broadcast %354 : f32 to vector<1x256xf32>
      %357 = arith.mulf %355, %356 : vector<1x256xf32>
      %358 = arith.addf %353, %357 : vector<1x256xf32>
      %c71 = arith.constant 71 : index
      %359 = memref.load %arg3[%c71] : memref<98xf32, #tpu.memory_space<smem>>
      %360 = vector.extract_strided_slice %302 {offsets = [0, 126], sizes = [1, 256], strides = [1, 1]} : vector<1x512xf32> to vector<1x256xf32>
      %361 = vector.broadcast %359 : f32 to vector<1x256xf32>
      %362 = arith.mulf %360, %361 : vector<1x256xf32>
      %363 = arith.addf %358, %362 : vector<1x256xf32>
      %c78 = arith.constant 78 : index
      %364 = memref.load %arg3[%c78] : memref<98xf32, #tpu.memory_space<smem>>
      %365 = vector.extract_strided_slice %302 {offsets = [0, 142], sizes = [1, 256], strides = [1, 1]} : vector<1x512xf32> to vector<1x256xf32>
      %366 = vector.broadcast %364 : f32 to vector<1x256xf32>
      %367 = arith.mulf %365, %366 : vector<1x256xf32>
      %368 = arith.addf %363, %367 : vector<1x256xf32>
      %c85 = arith.constant 85 : index
      %369 = memref.load %arg3[%c85] : memref<98xf32, #tpu.memory_space<smem>>
      %370 = vector.extract_strided_slice %302 {offsets = [0, 158], sizes = [1, 256], strides = [1, 1]} : vector<1x512xf32> to vector<1x256xf32>
      %371 = vector.broadcast %369 : f32 to vector<1x256xf32>
      %372 = arith.mulf %370, %371 : vector<1x256xf32>
      %373 = arith.addf %368, %372 : vector<1x256xf32>
      %c92 = arith.constant 92 : index
      %374 = memref.load %arg3[%c92] : memref<98xf32, #tpu.memory_space<smem>>
      %375 = vector.extract_strided_slice %302 {offsets = [0, 174], sizes = [1, 256], strides = [1, 1]} : vector<1x512xf32> to vector<1x256xf32>
      %376 = vector.broadcast %374 : f32 to vector<1x256xf32>
      %377 = arith.mulf %375, %376 : vector<1x256xf32>
      %378 = arith.addf %373, %377 : vector<1x256xf32>
      %379 = arith.mulf %378, %342 : vector<1x256xf32>
      %380 = arith.addf %341, %379 : vector<1x256xf32>
      %381 = vector.extract_strided_slice %22 {offsets = [2, 0], sizes = [1, 256], strides = [1, 1]} : vector<7x256xf32> to vector<1x256xf32>
      %cst_42 = arith.constant 0.000000e+00 : f32
      %382 = vector.broadcast %cst_42 : f32 to vector<1x256xf32>
      %c51 = arith.constant 51 : index
      %383 = memref.load %arg3[%c51] : memref<98xf32, #tpu.memory_space<smem>>
      %384 = vector.extract_strided_slice %302 {offsets = [0, 79], sizes = [1, 256], strides = [1, 1]} : vector<1x512xf32> to vector<1x256xf32>
      %385 = vector.broadcast %383 : f32 to vector<1x256xf32>
      %386 = arith.mulf %384, %385 : vector<1x256xf32>
      %387 = arith.addf %382, %386 : vector<1x256xf32>
      %c58 = arith.constant 58 : index
      %388 = memref.load %arg3[%c58] : memref<98xf32, #tpu.memory_space<smem>>
      %389 = vector.extract_strided_slice %302 {offsets = [0, 95], sizes = [1, 256], strides = [1, 1]} : vector<1x512xf32> to vector<1x256xf32>
      %390 = vector.broadcast %388 : f32 to vector<1x256xf32>
      %391 = arith.mulf %389, %390 : vector<1x256xf32>
      %392 = arith.addf %387, %391 : vector<1x256xf32>
      %c65 = arith.constant 65 : index
      %393 = memref.load %arg3[%c65] : memref<98xf32, #tpu.memory_space<smem>>
      %394 = vector.extract_strided_slice %302 {offsets = [0, 111], sizes = [1, 256], strides = [1, 1]} : vector<1x512xf32> to vector<1x256xf32>
      %395 = vector.broadcast %393 : f32 to vector<1x256xf32>
      %396 = arith.mulf %394, %395 : vector<1x256xf32>
      %397 = arith.addf %392, %396 : vector<1x256xf32>
      %c72 = arith.constant 72 : index
      %398 = memref.load %arg3[%c72] : memref<98xf32, #tpu.memory_space<smem>>
      %399 = vector.extract_strided_slice %302 {offsets = [0, 127], sizes = [1, 256], strides = [1, 1]} : vector<1x512xf32> to vector<1x256xf32>
      %400 = vector.broadcast %398 : f32 to vector<1x256xf32>
      %401 = arith.mulf %399, %400 : vector<1x256xf32>
      %402 = arith.addf %397, %401 : vector<1x256xf32>
      %c79 = arith.constant 79 : index
      %403 = memref.load %arg3[%c79] : memref<98xf32, #tpu.memory_space<smem>>
      %404 = vector.extract_strided_slice %302 {offsets = [0, 143], sizes = [1, 256], strides = [1, 1]} : vector<1x512xf32> to vector<1x256xf32>
      %405 = vector.broadcast %403 : f32 to vector<1x256xf32>
      %406 = arith.mulf %404, %405 : vector<1x256xf32>
      %407 = arith.addf %402, %406 : vector<1x256xf32>
      %c86 = arith.constant 86 : index
      %408 = memref.load %arg3[%c86] : memref<98xf32, #tpu.memory_space<smem>>
      %409 = vector.extract_strided_slice %302 {offsets = [0, 159], sizes = [1, 256], strides = [1, 1]} : vector<1x512xf32> to vector<1x256xf32>
      %410 = vector.broadcast %408 : f32 to vector<1x256xf32>
      %411 = arith.mulf %409, %410 : vector<1x256xf32>
      %412 = arith.addf %407, %411 : vector<1x256xf32>
      %c93 = arith.constant 93 : index
      %413 = memref.load %arg3[%c93] : memref<98xf32, #tpu.memory_space<smem>>
      %414 = vector.extract_strided_slice %302 {offsets = [0, 175], sizes = [1, 256], strides = [1, 1]} : vector<1x512xf32> to vector<1x256xf32>
      %415 = vector.broadcast %413 : f32 to vector<1x256xf32>
      %416 = arith.mulf %414, %415 : vector<1x256xf32>
      %417 = arith.addf %412, %416 : vector<1x256xf32>
      %418 = arith.mulf %417, %381 : vector<1x256xf32>
      %419 = arith.addf %380, %418 : vector<1x256xf32>
      %420 = vector.extract_strided_slice %22 {offsets = [3, 0], sizes = [1, 256], strides = [1, 1]} : vector<7x256xf32> to vector<1x256xf32>
      %cst_43 = arith.constant 0.000000e+00 : f32
      %421 = vector.broadcast %cst_43 : f32 to vector<1x256xf32>
      %c52 = arith.constant 52 : index
      %422 = memref.load %arg3[%c52] : memref<98xf32, #tpu.memory_space<smem>>
      %423 = vector.extract_strided_slice %302 {offsets = [0, 80], sizes = [1, 256], strides = [1, 1]} : vector<1x512xf32> to vector<1x256xf32>
      %424 = vector.broadcast %422 : f32 to vector<1x256xf32>
      %425 = arith.mulf %423, %424 : vector<1x256xf32>
      %426 = arith.addf %421, %425 : vector<1x256xf32>
      %c59 = arith.constant 59 : index
      %427 = memref.load %arg3[%c59] : memref<98xf32, #tpu.memory_space<smem>>
      %428 = vector.extract_strided_slice %302 {offsets = [0, 96], sizes = [1, 256], strides = [1, 1]} : vector<1x512xf32> to vector<1x256xf32>
      %429 = vector.broadcast %427 : f32 to vector<1x256xf32>
      %430 = arith.mulf %428, %429 : vector<1x256xf32>
      %431 = arith.addf %426, %430 : vector<1x256xf32>
      %c66 = arith.constant 66 : index
      %432 = memref.load %arg3[%c66] : memref<98xf32, #tpu.memory_space<smem>>
      %433 = vector.extract_strided_slice %302 {offsets = [0, 112], sizes = [1, 256], strides = [1, 1]} : vector<1x512xf32> to vector<1x256xf32>
      %434 = vector.broadcast %432 : f32 to vector<1x256xf32>
      %435 = arith.mulf %433, %434 : vector<1x256xf32>
      %436 = arith.addf %431, %435 : vector<1x256xf32>
      %c73 = arith.constant 73 : index
      %437 = memref.load %arg3[%c73] : memref<98xf32, #tpu.memory_space<smem>>
      %438 = vector.extract_strided_slice %302 {offsets = [0, 128], sizes = [1, 256], strides = [1, 1]} : vector<1x512xf32> to vector<1x256xf32>
      %439 = vector.broadcast %437 : f32 to vector<1x256xf32>
      %440 = arith.mulf %438, %439 : vector<1x256xf32>
      %441 = arith.addf %436, %440 : vector<1x256xf32>
      %c80 = arith.constant 80 : index
      %442 = memref.load %arg3[%c80] : memref<98xf32, #tpu.memory_space<smem>>
      %443 = vector.extract_strided_slice %302 {offsets = [0, 144], sizes = [1, 256], strides = [1, 1]} : vector<1x512xf32> to vector<1x256xf32>
      %444 = vector.broadcast %442 : f32 to vector<1x256xf32>
      %445 = arith.mulf %443, %444 : vector<1x256xf32>
      %446 = arith.addf %441, %445 : vector<1x256xf32>
      %c87 = arith.constant 87 : index
      %447 = memref.load %arg3[%c87] : memref<98xf32, #tpu.memory_space<smem>>
      %448 = vector.extract_strided_slice %302 {offsets = [0, 160], sizes = [1, 256], strides = [1, 1]} : vector<1x512xf32> to vector<1x256xf32>
      %449 = vector.broadcast %447 : f32 to vector<1x256xf32>
      %450 = arith.mulf %448, %449 : vector<1x256xf32>
      %451 = arith.addf %446, %450 : vector<1x256xf32>
      %c94 = arith.constant 94 : index
      %452 = memref.load %arg3[%c94] : memref<98xf32, #tpu.memory_space<smem>>
      %453 = vector.extract_strided_slice %302 {offsets = [0, 176], sizes = [1, 256], strides = [1, 1]} : vector<1x512xf32> to vector<1x256xf32>
      %454 = vector.broadcast %452 : f32 to vector<1x256xf32>
      %455 = arith.mulf %453, %454 : vector<1x256xf32>
      %456 = arith.addf %451, %455 : vector<1x256xf32>
      %457 = arith.mulf %456, %420 : vector<1x256xf32>
      %458 = arith.addf %419, %457 : vector<1x256xf32>
      %459 = vector.extract_strided_slice %22 {offsets = [4, 0], sizes = [1, 256], strides = [1, 1]} : vector<7x256xf32> to vector<1x256xf32>
      %cst_44 = arith.constant 0.000000e+00 : f32
      %460 = vector.broadcast %cst_44 : f32 to vector<1x256xf32>
      %c53 = arith.constant 53 : index
      %461 = memref.load %arg3[%c53] : memref<98xf32, #tpu.memory_space<smem>>
      %462 = vector.extract_strided_slice %302 {offsets = [0, 81], sizes = [1, 256], strides = [1, 1]} : vector<1x512xf32> to vector<1x256xf32>
      %463 = vector.broadcast %461 : f32 to vector<1x256xf32>
      %464 = arith.mulf %462, %463 : vector<1x256xf32>
      %465 = arith.addf %460, %464 : vector<1x256xf32>
      %c60 = arith.constant 60 : index
      %466 = memref.load %arg3[%c60] : memref<98xf32, #tpu.memory_space<smem>>
      %467 = vector.extract_strided_slice %302 {offsets = [0, 97], sizes = [1, 256], strides = [1, 1]} : vector<1x512xf32> to vector<1x256xf32>
      %468 = vector.broadcast %466 : f32 to vector<1x256xf32>
      %469 = arith.mulf %467, %468 : vector<1x256xf32>
      %470 = arith.addf %465, %469 : vector<1x256xf32>
      %c67 = arith.constant 67 : index
      %471 = memref.load %arg3[%c67] : memref<98xf32, #tpu.memory_space<smem>>
      %472 = vector.extract_strided_slice %302 {offsets = [0, 113], sizes = [1, 256], strides = [1, 1]} : vector<1x512xf32> to vector<1x256xf32>
      %473 = vector.broadcast %471 : f32 to vector<1x256xf32>
      %474 = arith.mulf %472, %473 : vector<1x256xf32>
      %475 = arith.addf %470, %474 : vector<1x256xf32>
      %c74 = arith.constant 74 : index
      %476 = memref.load %arg3[%c74] : memref<98xf32, #tpu.memory_space<smem>>
      %477 = vector.extract_strided_slice %302 {offsets = [0, 129], sizes = [1, 256], strides = [1, 1]} : vector<1x512xf32> to vector<1x256xf32>
      %478 = vector.broadcast %476 : f32 to vector<1x256xf32>
      %479 = arith.mulf %477, %478 : vector<1x256xf32>
      %480 = arith.addf %475, %479 : vector<1x256xf32>
      %c81 = arith.constant 81 : index
      %481 = memref.load %arg3[%c81] : memref<98xf32, #tpu.memory_space<smem>>
      %482 = vector.extract_strided_slice %302 {offsets = [0, 145], sizes = [1, 256], strides = [1, 1]} : vector<1x512xf32> to vector<1x256xf32>
      %483 = vector.broadcast %481 : f32 to vector<1x256xf32>
      %484 = arith.mulf %482, %483 : vector<1x256xf32>
      %485 = arith.addf %480, %484 : vector<1x256xf32>
      %c88 = arith.constant 88 : index
      %486 = memref.load %arg3[%c88] : memref<98xf32, #tpu.memory_space<smem>>
      %487 = vector.extract_strided_slice %302 {offsets = [0, 161], sizes = [1, 256], strides = [1, 1]} : vector<1x512xf32> to vector<1x256xf32>
      %488 = vector.broadcast %486 : f32 to vector<1x256xf32>
      %489 = arith.mulf %487, %488 : vector<1x256xf32>
      %490 = arith.addf %485, %489 : vector<1x256xf32>
      %c95 = arith.constant 95 : index
      %491 = memref.load %arg3[%c95] : memref<98xf32, #tpu.memory_space<smem>>
      %492 = vector.extract_strided_slice %302 {offsets = [0, 177], sizes = [1, 256], strides = [1, 1]} : vector<1x512xf32> to vector<1x256xf32>
      %493 = vector.broadcast %491 : f32 to vector<1x256xf32>
      %494 = arith.mulf %492, %493 : vector<1x256xf32>
      %495 = arith.addf %490, %494 : vector<1x256xf32>
      %496 = arith.mulf %495, %459 : vector<1x256xf32>
      %497 = arith.addf %458, %496 : vector<1x256xf32>
      %498 = vector.extract_strided_slice %22 {offsets = [5, 0], sizes = [1, 256], strides = [1, 1]} : vector<7x256xf32> to vector<1x256xf32>
      %cst_45 = arith.constant 0.000000e+00 : f32
      %499 = vector.broadcast %cst_45 : f32 to vector<1x256xf32>
      %c54 = arith.constant 54 : index
      %500 = memref.load %arg3[%c54] : memref<98xf32, #tpu.memory_space<smem>>
      %501 = vector.extract_strided_slice %302 {offsets = [0, 82], sizes = [1, 256], strides = [1, 1]} : vector<1x512xf32> to vector<1x256xf32>
      %502 = vector.broadcast %500 : f32 to vector<1x256xf32>
      %503 = arith.mulf %501, %502 : vector<1x256xf32>
      %504 = arith.addf %499, %503 : vector<1x256xf32>
      %c61 = arith.constant 61 : index
      %505 = memref.load %arg3[%c61] : memref<98xf32, #tpu.memory_space<smem>>
      %506 = vector.extract_strided_slice %302 {offsets = [0, 98], sizes = [1, 256], strides = [1, 1]} : vector<1x512xf32> to vector<1x256xf32>
      %507 = vector.broadcast %505 : f32 to vector<1x256xf32>
      %508 = arith.mulf %506, %507 : vector<1x256xf32>
      %509 = arith.addf %504, %508 : vector<1x256xf32>
      %c68 = arith.constant 68 : index
      %510 = memref.load %arg3[%c68] : memref<98xf32, #tpu.memory_space<smem>>
      %511 = vector.extract_strided_slice %302 {offsets = [0, 114], sizes = [1, 256], strides = [1, 1]} : vector<1x512xf32> to vector<1x256xf32>
      %512 = vector.broadcast %510 : f32 to vector<1x256xf32>
      %513 = arith.mulf %511, %512 : vector<1x256xf32>
      %514 = arith.addf %509, %513 : vector<1x256xf32>
      %c75 = arith.constant 75 : index
      %515 = memref.load %arg3[%c75] : memref<98xf32, #tpu.memory_space<smem>>
      %516 = vector.extract_strided_slice %302 {offsets = [0, 130], sizes = [1, 256], strides = [1, 1]} : vector<1x512xf32> to vector<1x256xf32>
      %517 = vector.broadcast %515 : f32 to vector<1x256xf32>
      %518 = arith.mulf %516, %517 : vector<1x256xf32>
      %519 = arith.addf %514, %518 : vector<1x256xf32>
      %c82 = arith.constant 82 : index
      %520 = memref.load %arg3[%c82] : memref<98xf32, #tpu.memory_space<smem>>
      %521 = vector.extract_strided_slice %302 {offsets = [0, 146], sizes = [1, 256], strides = [1, 1]} : vector<1x512xf32> to vector<1x256xf32>
      %522 = vector.broadcast %520 : f32 to vector<1x256xf32>
      %523 = arith.mulf %521, %522 : vector<1x256xf32>
      %524 = arith.addf %519, %523 : vector<1x256xf32>
      %c89 = arith.constant 89 : index
      %525 = memref.load %arg3[%c89] : memref<98xf32, #tpu.memory_space<smem>>
      %526 = vector.extract_strided_slice %302 {offsets = [0, 162], sizes = [1, 256], strides = [1, 1]} : vector<1x512xf32> to vector<1x256xf32>
      %527 = vector.broadcast %525 : f32 to vector<1x256xf32>
      %528 = arith.mulf %526, %527 : vector<1x256xf32>
      %529 = arith.addf %524, %528 : vector<1x256xf32>
      %c96 = arith.constant 96 : index
      %530 = memref.load %arg3[%c96] : memref<98xf32, #tpu.memory_space<smem>>
      %531 = vector.extract_strided_slice %302 {offsets = [0, 178], sizes = [1, 256], strides = [1, 1]} : vector<1x512xf32> to vector<1x256xf32>
      %532 = vector.broadcast %530 : f32 to vector<1x256xf32>
      %533 = arith.mulf %531, %532 : vector<1x256xf32>
      %534 = arith.addf %529, %533 : vector<1x256xf32>
      %535 = arith.mulf %534, %498 : vector<1x256xf32>
      %536 = arith.addf %497, %535 : vector<1x256xf32>
      %537 = vector.extract_strided_slice %22 {offsets = [6, 0], sizes = [1, 256], strides = [1, 1]} : vector<7x256xf32> to vector<1x256xf32>
      %cst_46 = arith.constant 0.000000e+00 : f32
      %538 = vector.broadcast %cst_46 : f32 to vector<1x256xf32>
      %c55 = arith.constant 55 : index
      %539 = memref.load %arg3[%c55] : memref<98xf32, #tpu.memory_space<smem>>
      %540 = vector.extract_strided_slice %302 {offsets = [0, 83], sizes = [1, 256], strides = [1, 1]} : vector<1x512xf32> to vector<1x256xf32>
      %541 = vector.broadcast %539 : f32 to vector<1x256xf32>
      %542 = arith.mulf %540, %541 : vector<1x256xf32>
      %543 = arith.addf %538, %542 : vector<1x256xf32>
      %c62 = arith.constant 62 : index
      %544 = memref.load %arg3[%c62] : memref<98xf32, #tpu.memory_space<smem>>
      %545 = vector.extract_strided_slice %302 {offsets = [0, 99], sizes = [1, 256], strides = [1, 1]} : vector<1x512xf32> to vector<1x256xf32>
      %546 = vector.broadcast %544 : f32 to vector<1x256xf32>
      %547 = arith.mulf %545, %546 : vector<1x256xf32>
      %548 = arith.addf %543, %547 : vector<1x256xf32>
      %c69 = arith.constant 69 : index
      %549 = memref.load %arg3[%c69] : memref<98xf32, #tpu.memory_space<smem>>
      %550 = vector.extract_strided_slice %302 {offsets = [0, 115], sizes = [1, 256], strides = [1, 1]} : vector<1x512xf32> to vector<1x256xf32>
      %551 = vector.broadcast %549 : f32 to vector<1x256xf32>
      %552 = arith.mulf %550, %551 : vector<1x256xf32>
      %553 = arith.addf %548, %552 : vector<1x256xf32>
      %c76 = arith.constant 76 : index
      %554 = memref.load %arg3[%c76] : memref<98xf32, #tpu.memory_space<smem>>
      %555 = vector.extract_strided_slice %302 {offsets = [0, 131], sizes = [1, 256], strides = [1, 1]} : vector<1x512xf32> to vector<1x256xf32>
      %556 = vector.broadcast %554 : f32 to vector<1x256xf32>
      %557 = arith.mulf %555, %556 : vector<1x256xf32>
      %558 = arith.addf %553, %557 : vector<1x256xf32>
      %c83 = arith.constant 83 : index
      %559 = memref.load %arg3[%c83] : memref<98xf32, #tpu.memory_space<smem>>
      %560 = vector.extract_strided_slice %302 {offsets = [0, 147], sizes = [1, 256], strides = [1, 1]} : vector<1x512xf32> to vector<1x256xf32>
      %561 = vector.broadcast %559 : f32 to vector<1x256xf32>
      %562 = arith.mulf %560, %561 : vector<1x256xf32>
      %563 = arith.addf %558, %562 : vector<1x256xf32>
      %c90 = arith.constant 90 : index
      %564 = memref.load %arg3[%c90] : memref<98xf32, #tpu.memory_space<smem>>
      %565 = vector.extract_strided_slice %302 {offsets = [0, 163], sizes = [1, 256], strides = [1, 1]} : vector<1x512xf32> to vector<1x256xf32>
      %566 = vector.broadcast %564 : f32 to vector<1x256xf32>
      %567 = arith.mulf %565, %566 : vector<1x256xf32>
      %568 = arith.addf %563, %567 : vector<1x256xf32>
      %c97 = arith.constant 97 : index
      %569 = memref.load %arg3[%c97] : memref<98xf32, #tpu.memory_space<smem>>
      %570 = vector.extract_strided_slice %302 {offsets = [0, 179], sizes = [1, 256], strides = [1, 1]} : vector<1x512xf32> to vector<1x256xf32>
      %571 = vector.broadcast %569 : f32 to vector<1x256xf32>
      %572 = arith.mulf %570, %571 : vector<1x256xf32>
      %573 = arith.addf %568, %572 : vector<1x256xf32>
      %574 = arith.mulf %573, %537 : vector<1x256xf32>
      %575 = arith.addf %536, %574 : vector<1x256xf32>
      %576 = arith.negf %575 : vector<1x256xf32>
      %577 = math.exp %576 : vector<1x256xf32>
      %cst_47 = arith.constant 1.000000e+00 : f32
      %578 = vector.broadcast %cst_47 : f32 to vector<1x256xf32>
      %579 = arith.addf %578, %577 : vector<1x256xf32>
      %580 = arith.divf %578, %579 : vector<1x256xf32>
      %c0_48 = arith.constant 0 : index
      %c0_49 = arith.constant 0 : index
      %c0_50 = arith.constant 0 : index
      %581 = vector.load %arg5[%c0_48, %c0_49, %c0_50] : memref<1x1x256xf32, #tpu.memory_space<vmem>>, vector<1x1x256xf32>
      %582 = vector.shape_cast %581 : vector<1x1x256xf32> to vector<1x256xf32>
      %583 = vector.shape_cast %580 : vector<1x256xf32> to vector<1x1x256xf32>
      tpu.vector_store %arg5[%c0_48, %c0_49, %c0_50], %583 {strides = array<i32>} : memref<1x1x256xf32, #tpu.memory_space<vmem>>, vector<1x1x256xf32>,
    } else {
    }
    return
  }
  func.func @transform_0(%arg0: i32, %arg1: i32) -> (i32, i32, i32) {
    %c0_i32 = arith.constant 0 : i32
    %c0_i32_0 = arith.constant 0 : i32
    return %arg0, %arg1, %c0_i32 : i32, i32, i32
  }
  func.func @transform_1(%arg0: i32, %arg1: i32) -> i32 {
    %c0_i32 = arith.constant 0 : i32
    %c0_i32_0 = arith.constant 0 : i32
    return %c0_i32 : i32
  }
  func.func @transform_2(%arg0: i32, %arg1: i32) -> (i32, i32) {
    %c0_i32 = arith.constant 0 : i32
    %c0_i32_0 = arith.constant 0 : i32
    %c0_i32_1 = arith.constant 0 : i32
    return %c0_i32, %c0_i32_0 : i32, i32
  }
  func.func @transform_3(%arg0: i32, %arg1: i32) -> (i32, i32, i32) {
    %c0_i32 = arith.constant 0 : i32
    %c0_i32_0 = arith.constant 0 : i32
    %c0_i32_1 = arith.constant 0 : i32
    return %arg0, %c0_i32, %c0_i32_0 : i32, i32, i32
  }
}

</mosaic_0001>

<bundles_post_ra>
// kernel: tpu_custom_call.1
= control target key start
LH: loop header
LB: loop body
LE: loop exit
PB: predicated region body
PF: predicated region fallthrough
CT: control target
= control target key end

     0   :  { %s3485_s0 = inlined_call_operand.hbm [shape: f32[2,4,256], index: 0, kind: input, shape index: {}]   ;;  %s3486_s1 = inlined_call_operand.vmem [shape: f32[98], index: 1, kind: input, shape index: {}]   ;;  %s3487_s2 = inlined_call_operand.hbm [shape: f32[7,256], index: 2, kind: input, shape index: {}]   ;;  %s3488_s3 = inlined_call_operand.hbm [shape: f32[2,1,256], index: 3, kind: output, shape index: {}]  }
   0x1   :  { %3523 = sst [smem:[#allocation17_spill]] %s3485_s0 }
   0x2   :  { %3524 = sst [smem:[#allocation18_spill]] %s3486_s1 }
   0x3   :  { %8 = vsyncpa [#allocation6], 0 }
   0x4   :  { %10 = vsyncpa [#allocation6 + $0x1], 0 }
   0x5   :  { %11 = vsyncpa [#allocation8], 0 }
   0x6   :  { %12 = vsyncpa [#allocation11], 0 }
   0x7   :  { %13 = vsyncpa [#allocation7], 0 }
   0x8   :  { %15 = vsyncpa [#allocation7 + $0x1], 0  ;;  %s2334_s12 = smov 0   ;;  %s2336_s13 = smov 0  }
   0x9   :  { %s2338_s14 = smov 0   ;;  %s2340_s15 = smov 0  }
   0xa   :  { %s2342_s16 = smov 0   ;;  %s2344_s17 = smov 0  }
   0xb LB: > { %s1870_s18 = sadd.s32 4294967295, %s2277_s17   ;;  %s1871_s19 = sadd.s32 4294967294, %s2277_s17   ;;  %s2277_s17 = sphi %s2344_s17, %s21_s17   ;;  %s2273_s16 = sphi %s2342_s16, %s3585_s16   ;;  %s2269_s15 = sphi %s2340_s15, %s3584_s15   ;;  %s2265_s14 = sphi %s2338_s14, %s3583_s14   ;;  %s2261_s13 = sphi %s2336_s13, %s3582_s13   ;;  %s2257_s12 = sphi %s2334_s12, %s3581_s12  }
   0xc   : > { %p55_p0 = scmp.ne.s32.totalorder %s2261_s13, %s2257_s12  ;;  %p2368_p1 = scmp.eq.s32.totalorder %s1870_s18, 0 }
   0xd   : > { %p2372_p2 = scmp.eq.s32.totalorder %s1870_s18, 1  ;;  %p127_p3 = scmp.eq.s32.totalorder %s1871_s19, 1 }
   0xe   : > { %s3525_s20 = scalar_select %p2368_p1, 1, 0 }
   0xf   : > { %p2378_p4 = por %p2368_p1, %p55_p0  ;;  %p1872_p5 = scmp.ge.s32.totalorder %s2277_s17, 1 }
  0x10   : > { %p2383_p6 = por %p127_p3, %p55_p0  ;;  %p134_p7 = scmp.lt.s32.totalorder %s2277_s17, 3 }
  0x11   : > { %s3527_s22 = scalar_select %p2378_p4, 1, 0 }
  0x12   : > { %s3528_s23 = scalar_select %p2383_p6, 1, 0 }
  0x13   : > { %s3529_s1 = sld [smem:[#allocation18_spill]]  ;;  %p2391_p8 = pnand %p1872_p5, %p134_p7 }
  0x14   : > { %s2279_s28 = smov [#allocation10]  }
  0x15   : > { %p2001_p10 = pneg %p2391_p8  ;;  %s158_s29 = sshll.u32 %s2279_s28, 4  ;;  %s2404_s29 = int_to_ptr.vmem [resolvable:$true] %s158_s29 }
  0x17   : > { %p2400_p11 = pnand %p2001_p10, %p2368_p1 }
  0x19   : > { %s147_s26 = sshll.u32 %s3529_s1, 4  ;;  %p2116_p13 = pneg %p2400_p11  ;;  %s148_s26 = int_to_ptr.vmem [resolvable:$true] %s147_s26 }
  0x1a   : > { %s2114_s4 = scalar_lea.vmem %s148_s26, 16  ;;  %p2122_p5 = scmp.lt.s32.totalorder %s148_s26, %s148_s26 }
  0x1b   : > { %p2115_p12 = scmp.ne.s32.totalorder %s148_s26, %s2114_s4  ;;  %p2123_p7 = scmp.lt.s32.totalorder %s2114_s4, %s2114_s4 }
  0x1d   : > { %p2117_p0 = pnand %p2116_p13, %p2115_p12  ;;  %p2124_p9 = por %p2123_p7, %p2122_p5 }
  0x1f   : > { %p2118_p3 = pneg %p2117_p0 }
  0x21   : > { %p2125_p6 = pnand %p2124_p9, %p2118_p3 }
  0x23   : > { %2128 = shalt.err (!%p2125_p6)
}
  0x24   : > { %s2280_s5 = smov [#allocation9]   ;;  %s2129_s8 = scalar_lea.hbm %s3487_s2, 256 }
  0x25   : > { %2004 = dma.vmem_to_smem (!%p2400_p11), %s148_s26, 16, %s2280_s5, [#allocation8]  }
  0x26   : > { %p2130_p10 = scmp.ne.s32.totalorder %s3487_s2, %s2129_s8  ;;  %p2136_p6 = scmp.lt.u32.totalorder %s2129_s8, %s3487_s2 }
  0x28   : > { %p2132_p12 = pnand %p2130_p10, %p2116_p13 }
  0x2a   : > { %p2133_p0 = pneg %p2132_p12 }
  0x2c   : > { %p2138_p9 = pnand %p2136_p6, %p2133_p0 }
  0x2e   : > { %2141 = shalt.err (!%p2138_p9)
}
  0x2f   : > { %s2142_s19 = scalar_lea.vmem %s2404_s29, 256  ;;  %p2150_p1 = scmp.lt.s32.totalorder %s2404_s29, %s2404_s29 }
  0x30   : > { %p2143_p3 = scmp.ne.s32.totalorder %s2404_s29, %s2142_s19  ;;  %p2151_p10 = scmp.lt.s32.totalorder %s2142_s19, %s2142_s19 }
  0x32   : > { %p2145_p5 = pnand %p2143_p3, %p2116_p13  ;;  %p2152_p12 = por %p2151_p10, %p2150_p1 }
  0x34   : > { %p2146_p7 = pneg %p2145_p5 }
  0x36   : > { %p2153_p4 = pnand %p2152_p12, %p2146_p7 }
  0x38   : > { %2156 = shalt.err (!%p2153_p4)
}
  0x39   : > { %2007 = dma.hbm_to_vmem [thread:$0]  (!%p2400_p11), %s3487_s2, 256, %s2404_s29, [#allocation11]  }
  0x3a   : > { %s33_s26 = sadd.s32 1, %s2273_s16  ;;  %s42_s28 = sadd.s32 1, %s2265_s14 }
  0x3b   : > { %p35_p1 = scmp.ge.s32.totalorder %s33_s26, 2  ;;  %p49_p4 = scmp.ne.s32.totalorder %s2265_s14, %s2261_s13 }
  0x3c   : > { %p50_p13 = scmp.eq.s32.totalorder %s2277_s17, 0  ;;  %p2018_p0 = scmp.lt.s32.totalorder %s2277_s17, 2 }
  0x3d   : > { %s3587_s26 = smov (%p35_p1, %s33_s26), 0  ;;  %p2448_p9 = por %p2372_p2, %p49_p4 }
  0x3e   : > { %p51_p6 = por %p50_p13, %p49_p4  ;;  %s37_s4 = ssub.s32 %s2273_s16, %s3587_s26 }
  0x3f   : > { %s3532_s30 = scalar_select %p2448_p9, 1, 0 }
  0x40   : > { %s169_s5 = sand.u32 1, %s2265_s14   ;;  %p40_p3 = scmp.eq.s32.totalorder %s37_s4, 0 }
  0x41   : > { %s1876_s29 = sshll.u32 %s169_s5, 3  ;;  %s1987_s6 = sshll.u32 %s2273_s16, 7 }
  0x42   : > { %s2457_s7 = scalar_select %p40_p3, %s2265_s14, %s42_s28  }
  0x43   : > { %s3533_s0 = sld [smem:[#allocation17_spill]]  ;;  %s173_s21 = scalar_lea.vmem [#allocation5], %s1876_s29 }
  0x44   : > { %s183_s11 = sshll.u32 %s173_s21, 4  ;;  %p2466_p2 = pnand %p2018_p0, %p51_p6  ;;  %s2470_s11 = int_to_ptr.vmem [resolvable:$true] %s183_s11 }
  0x45   : > { %s170_s19 = scalar_lea.sflag [#allocation6], %s169_s5 }
  0x46   : > { %p2159_p5 = pneg %p2466_p2 }
  0x49   : > { %s2462_s10 = scalar_lea.hbm %s3533_s0, %s1987_s6  ;;  %s2162_s4 = scalar_lea.hbm %s3533_s0, 256 }
  0x4a   : > { %s2157_s24 = scalar_lea.hbm %s2462_s10, 128  ;;  %p2163_p12 = scmp.lt.u32.totalorder %s2462_s10, %s3533_s0 }
  0x4b   : > { %p2158_p11 = scmp.ne.s32.totalorder %s2462_s10, %s2157_s24  ;;  %p2164_p1 = scmp.lt.u32.totalorder %s2162_s4, %s2157_s24 }
  0x4c   : > { %p2166_p13 = scmp.lt.u32.totalorder %s2157_s24, %s2462_s10 }
  0x4d   : > { %p2160_p7 = pnand %p2159_p5, %p2158_p11  ;;  %p2165_p4 = por %p2164_p1, %p2163_p12 }
  0x4f   : > { %p2161_p10 = pneg %p2160_p7  ;;  %p2167_p0 = por %p2166_p13, %p2165_p4 }
  0x51   : > { %p2168_p6 = pnand %p2167_p0, %p2161_p10 }
  0x53   : > { %2171 = shalt.err (!%p2168_p6)
}
  0x54   : > { %s2172_s5 = scalar_lea.vmem %s2470_s11, 128  ;;  %s2281_s8 = smov [#allocation5]  }
  0x55   : > { %p2173_p3 = scmp.ne.s32.totalorder %s2470_s11, %s2172_s5  ;;  %s2177_s9 = sshll.u32 %s2281_s8, 4  ;;  %s2178_s9 = int_to_ptr.vmem [resolvable:$false] %s2177_s9 }
  0x56   : > { %s2179_s21 = scalar_lea.vmem %s2178_s9, 256  ;;  %p2180_p9 = scmp.lt.s32.totalorder %s2470_s11, %s2178_s9 }
  0x57   : > { %p2175_p11 = pnand %p2173_p3, %p2159_p5  ;;  %p2181_p12 = scmp.lt.s32.totalorder %s2179_s21, %s2172_s5 }
  0x59   : > { %p2176_p7 = pneg %p2175_p11  ;;  %p2182_p1 = por %p2181_p12, %p2180_p9 }
  0x5b   : > { %p2183_p4 = pnand %p2182_p1, %p2176_p7 }
  0x5d   : > { %2186 = shalt.err (!%p2183_p4)
}
  0x5e   : > { %2011 = dma.hbm_to_vmem [thread:$0]  (!%p2466_p2), %s2462_s10, 128, %s2470_s11, %s170_s19  }
  0x5f   : > { %192 = sbr.rel (%p2391_p8) target bundleno = 802 (0x322), region = 32  ;;  %s2500_s24 = sand.u32 (!%p2391_p8), 1, %s2261_s13  }
  0x60   : > { %s1880_s25 = sshll.u32 (!%p2391_p8), %s2500_s24, 3  ;;  %s195_s28 = scalar_lea.sflag (!%p2391_p8), [#allocation6], %s2500_s24 }
  0x61   : > { %s198_s4 = scalar_lea.vmem (!%p2391_p8), [#allocation5], %s1880_s25  ;;  %p3535_p9 = scmp.ne.s32.totalorder (!%p2391_p8), %s3527_s22, 0 }
  0x66   : > { %2240 = dma.done.wait (%p3535_p9), %s195_s28, 128  }
  0x67   : > { %2242 = vsyncadd (%p3535_p9), %s195_s28, 4294967168  ;;  %p3536_p5 = scmp.ne.s32.totalorder %s3525_s20, 0 }
  0x69   : > { %2244 = dma.done.wait (%p3536_p5), [#allocation8], 16  }
  0x6a   : > { %2246 = vsyncadd (%p3536_p5), [#allocation8], 4294967280 }
  0x6b   : > { %2248 = dma.done.wait (%p3536_p5), [#allocation11], 256  }
  0x6c   : > { %2250 = vsyncadd (%p3536_p5), [#allocation11], 4294967040 }
  0x6d   : > { %211 = sfence }
  0x6e   : > { %v234_v0 = vlaneseq  ;;  %v240_v1 = vld [vmem:[%s198_s4] sm:$0xff]  ;;  %vm245_vm0 = vcmask 1043456   ;;  %v2282_v5 = vmov 0.0   ;;  %v2283_v8 = vmov -inf   ;;  %s2285_s20 = smov 114   ;;  %s2286_s22 = smov 113  }
  0x6f   : > { %v243_v2 = vcombine.high %v240_v1, %v240_v1  ;;  %v246_v3 = vsel %vm245_vm0, %v240_v1, 0.0  ;;  %v285_v4 = vsel %vm245_vm0, %v240_v1, -inf  ;;  %327 = vst [vmem:[#allocation4] sm:$0xff] %v2282_v5  ;;  %v2284_v18 = vmov 1966171168   ;;  %s2287_s27 = smov 98  }
  0x70   : > { %vm2516_vm1 = vcmp.lt.s32.totalorder %v234_v0, 256  ;;  %v247_v7 = vrot.slane %v246_v3, 4  ;;  %v286_v10 = vrot.slane %v285_v4, 4  ;;  %v264_v19 = vunpack.c.l.s4 %v2284_v18  ;;  %s3503_s10 = smov 82   ;;  %s2289_s11 = smov 97  }
  0x71   : > { %239 = vst.msk [vmem:[#allocation3] sm:$0x3] %vm2516_vm1, %v2283_v8  ;;  %v253_v9 = vsel %vm245_vm0, %v243_v2, 0.0  ;;  %v292_v11 = vsel %vm245_vm0, %v243_v2, -inf  ;;  %238 = vst.msk [vmem:[#allocation2] sm:$0x3] %vm2516_vm1, %v2282_v5 }
  0x72   : > { %v248_v12 = vadd.f32 %v247_v7, %v246_v3  ;;  %v254_v13 = vrot.slane %v253_v9, 4  ;;  %v293_v14 = vrot.slane %v292_v11, 4  ;;  %v287_v15 = vmax.f32 %v285_v4, %v286_v10  ;;  %s3505_s18 = smov 112   ;;  %s3501_s19 = smov 127  }
  0x73   : > { %v267_v25 = vshrl.u32 %v234_v0, 7  ;;  %v265_v29 = vunpack.c.0.s8 %v264_v19  ;;  %s3498_s29 = smov 81   ;;  %s3520_s6 = smov 96   ;;  %vm505_vm2 = vcmask 801792   ;;  %vm487_vm3 = vcmask 932864  }
  0x74   : > { %v249_v16 = vrot.slane %v248_v12, 2  ;;  %v255_v17 = vadd.f32 %v254_v13, %v253_v9  ;;  %v294_v20 = vmax.f32 %v292_v11, %v293_v14  ;;  %v288_v21 = vrot.slane %v287_v15, 2  ;;  %s3493_s5 = smov 111   ;;  %s3496_s8 = smov 126   ;;  %v2104_v11 = vld [vmem:[#allocation10] ss:$8 sps:$4 sm:$0xff]  }
  0x75   : > { %v2524_v37 = vsub.s32 %v265_v29, %v267_v25  ;;  %s3494_s9 = smov 80   ;;  %s2297_s21 = smov 95   ;;  %vm613_vm4 = vcmask 793600   ;;  %vm595_vm5 = vcmask 924672   ;;  %vm551_vm6 = vcmask 1039360  }
  0x76   : > { %v250_v22 = vadd.f32 %v249_v16, %v248_v12  ;;  %v256_v23 = vrot.slane %v255_v17, 2  ;;  %v295_v24 = vrot.slane %v294_v20, 2  ;;  %v289_v26 = vmax.f32 %v287_v15, %v288_v21  ;;  %s2298_s25 = smov 110   ;;  %s3507_s28 = smov 125  }
  0x77   : > { %s2300_s4 = smov 79   ;;  %v432_v16 = vrot.slane %v2104_v11, %v2524_v37  ;;  %vm522_vm7 = vcmask 670720   ;;  %vm630_vm8 = vcmask 662528   ;;  %vm344_vm9 = vcmask 916480   ;;  %s3090_s0 = sld [smem:[#allocation9 + $0x23]] }
  0x78   : > { %v251_v27 = vrot.slane %v250_v22, 1  ;;  %v257_v28 = vadd.f32 %v256_v23, %v255_v17  ;;  %v296_v30 = vmax.f32 %v294_v20, %v295_v24  ;;  %v290_v31 = vrot.slane %v289_v26, 1  ;;  %v284_v43 = vld [vmem:[#allocation3] sm:$0x3]  ;;  %v241_v44 = vld [vmem:[#allocation2] sm:$0x3] }
  0x79   : > { %v533_v21 = vcombine.high %v432_v16, %v432_v16  ;;  %vm801_vm10 = vcmask 908288   ;;  %vm355_vm11 = vcmask 785408   ;;  %vm3513_vm12 = vcmask 654336   ;;  %s3098_s1 = sld [smem:[#allocation9 + $0x2a]]  ;;  %p3578_p2 = scmp.ne.s32.totalorder %s3532_s30, 0 }
  0x7a   : > { %v252_v32 = vadd.f32 %v251_v27, %v250_v22  ;;  %v258_v33 = vrot.slane %v257_v28, 1  ;;  %v297_v34 = vrot.slane %v296_v30, 1  ;;  %v291_v35 = vmax.f32 %v289_v26, %v290_v31 }
  0x7b   : > { %v540_v25 = vrot.slane %v533_v21, %v2524_v37  ;;  %v2654_v26 = vrot.slane %v432_v16, %v2524_v37  ;;  %vm652_vm13 = vcmask 1031168   ;;  %vm3512_vm14 = vcmask 900096  }
  0x7c   : > { %v259_v36 = vadd.f32 %v258_v33, %v257_v28  ;;  %v298_v38 = vmax.f32 %v296_v30, %v297_v34  ;;  %vm818_vm15 = vcmask 777216   ;;  %vm3514_vm0 = vcmask 646144  }
  0x7d   : > { %v641_v31 = vcombine.high %v2654_v26, %v2654_v26 }
  0x7e   : > { %v262_v39 = vcombine.low %v252_v32, %v259_v36  ;;  %v301_v40 = vcombine.low %v291_v35, %v298_v38 }
  0x80   : > { %v269_v41 = vrot.slane %v262_v39, %v2524_v37  ;;  %v308_v42 = vrot.slane %v301_v40, %v2524_v37  ;;  %v740_v40 = vcombine.high %v540_v25, %v540_v25 }
  0x82   : > { %v276_v45 = vrot.slane %v269_v41, %v2524_v37  ;;  %v315_v46 = vrot.slane %v308_v42, %v2524_v37 }
  0x84   : > { %v317_v47 = vmax.f32 %v284_v43, %v315_v46  ;;  %v278_v48 = vadd.f32 %v276_v45, %v241_v44 }
  0x86   : > { %318 = vst.msk [vmem:[#allocation3] sm:$0x3] %vm2516_vm1, %v317_v47  ;;  %283 = vst.msk [vmem:[#allocation2] sm:$0x3] %vm2516_vm1, %v278_v48 }
  0x8d   : > { %v324_v49 = vld [vmem:[#allocation3] sm:$0x3]  ;;  %v322_v50 = vld [vmem:[#allocation2] sm:$0x3] }
  0x8e   : > { %331 = vst.msk [vmem:[#allocation4 + $0x3] ss:$2 sm:$0x3] %vm2516_vm1, %v324_v49  ;;  %v323_v51 = vmul.f32 0.25, %v322_v50 }
  0x90   : > { %329 = vst.msk [vmem:[#allocation4 + $0x2] ss:$2 sm:$0x3] %vm2516_vm1, %v323_v51 }
  0x95   : > { %v2538_v52 = vld [vmem:[#allocation4 + $0x1] ss:$2 sm:$0xf] }
  0x96   : > { %1214 = vrot.lane.b32.xlu1 %v2538_v52, %s2285_s20 }
  0x97   : > { %v2541_v53 = vld [vmem:[#allocation4] ss:$2 sm:$0xf] }
  0x98   : > { %483 = vrot.lane.b32.xlu0 %v2541_v53, %s2285_s20  ;;  %s2301_s20 = smov 94   ;;  %v682_v9 = vrot.slane %v2541_v53, 1 }
  0x9a   : > { %591 = vrot.lane.b32.xlu1 %v2541_v53, %s2286_s22 }
  0x9c   : > { %501 = vrot.lane.b32.xlu0 %v2541_v53, %s2287_s27 }
  0x9e   : > { %518 = vrot.lane.b32.xlu1 %v2541_v53, %s3503_s10 }
  0xa0   : > { %609 = vrot.lane.b32.xlu0 %v2541_v53, %s2289_s11 }
  0xa2   : > { %694 = vrot.lane.b32.xlu1 %v2541_v53, %s3505_s18 }
  0xa4   : > { %781 = vrot.lane.b32.xlu0 %v2541_v53, %s3501_s19 }
  0xa6   : > { %626 = vrot.lane.b32.xlu1 %v2541_v53, %s3498_s29  ;;  %s3509_s29 = smov 77  }
  0xa8   : > { %710 = vrot.lane.b32.xlu0 %v2541_v53, %s3520_s6 }
  0xaa   : > { %797 = vrot.lane.b32.xlu1 %v2541_v53, %s3493_s5  ;;  %s2302_s5 = smov 109  }
  0xac   : > { %900 = vrot.lane.b32.xlu0 %v2541_v53, %s3496_s8  ;;  %s3500_s8 = smov 93  }
  0xae   : > { %726 = vrot.lane.b32.xlu1 %v2541_v53, %s3494_s9  ;;  %s2303_s9 = smov 78  }
  0xb0   : > { %814 = vrot.lane.b32.xlu0 %v2541_v53, %s2297_s21 }
  0xb2   : > { %916 = vrot.lane.b32.xlu1 %v2541_v53, %s2298_s25 }
  0xb4   : > { %1012 = vrot.lane.b32.xlu0 %v2541_v53, %s3507_s28 }
  0xb6   : > { %831 = vrot.lane.b32.xlu1 %v2541_v53, %s2300_s4 }
  0xb8   : > { %933 = vrot.lane.b32.xlu0 %v2541_v53, %s2301_s20 }
  0xba   : > { %1028 = vrot.lane.b32.xlu1 %v2541_v53, %s2302_s5 }
  0xbc   : > { %950 = vrot.lane.b32.xlu0 %v2541_v53, %s2303_s9 }
  0xbe   : > { %1045 = vrot.lane.b32.xlu1 %v2541_v53, %s3500_s8  ;;  %s3539_s8 = smov 81  }
  0xc0   : > { %1062 = vrot.lane.b32.xlu0 %v2541_v53, %s3509_s29 }
  0xc2   : > { %1304 = vrot.lane.b32.xlu1 %v2538_v52, %s2286_s22  ;;  %s3540_s22 = smov 126  }
  0xc4   : > { %1230 = vrot.lane.b32.xlu0 %v2538_v52, %s2287_s27  ;;  %s3541_s27 = smov 111  }
  0xc6   : > { %1320 = vrot.lane.b32.xlu1 %v2538_v52, %s2289_s11  ;;  %s3542_s11 = smov 80  }
  0xc8   : > { %1246 = vrot.lane.b32.xlu0 %v2538_v52, %s3503_s10  ;;  %s1891_s10 = sld [smem:[#allocation9 + $0x8]] }
  0xca   : > { %1476 = vrot.lane.b32.xlu1 %v2538_v52, %s3501_s19  ;;  %s1892_s19 = sld [smem:[#allocation9 + $0xf]] }
  0xcc   : > { %1396 = vrot.lane.b32.xlu0 %v2538_v52, %s3505_s18  ;;  %s1898_s18 = sld [smem:[#allocation9 + $0x9]] }
  0xce   : > { %1412 = vrot.lane.b32.xlu1 %v2538_v52, %s3520_s6  ;;  %v452_v55 = vstv %s1891_s10  ;;  %s1906_s10 = sld [smem:[#allocation9 + $0x11]] }
  0xcf   : > { %v453_v57 = vmul.f32 %v452_v55, %v2541_v53 }
  0xd0   : > { %1336 = vrot.lane.b32.xlu0 %v2538_v52, %s3539_s8  ;;  %v462_v54 = vstv %s1892_s19  ;;  %s1900_s19 = sld [smem:[#allocation9 + $0x17]] }
  0xd1   : > { %v463_v56 = vmul.f32 %v462_v54, %v2541_v53 }
  0xd2   : > { %1572 = vrot.lane.b32.xlu1 %v2538_v52, %s3540_s22  ;;  %v560_v58 = vstv %s1898_s18  ;;  %s1907_s18 = sld [smem:[#allocation9 + $0x18]] }
  0xd3   : > { %v561_v60 = vmul.f32 %v560_v58, %v2541_v53 }
  0xd4   : > { %1492 = vrot.lane.b32.xlu0 %v2538_v52, %s3541_s27  ;;  %s1893_s27 = sld [smem:[#allocation9 + $0x16]]  ;;  %v671_v3 = vstv %s1906_s10  ;;  %s1927_s10 = sld [smem:[#allocation9 + $0x14]] }
  0xd5   : > { %v672_v7 = vmul.f32 %v671_v3, %v2541_v53 }
  0xd6   : > { %1508 = vrot.lane.b32.xlu1 %v2538_v52, %s2297_s21  ;;  %s1899_s21 = sld [smem:[#allocation9 + $0x10]]  ;;  %v580_v1 = vstv %s1900_s19  ;;  %s1926_s19 = sld [smem:[#allocation9 + $0xd]] }
  0xd7   : > { %v581_v4 = vmul.f32 %v580_v1, %v2541_v53 }
  0xd8   : > { %1428 = vrot.lane.b32.xlu0 %v2538_v52, %s3542_s11  ;;  %v681_v10 = vstv %s1907_s18  ;;  %s1940_s18 = sld [smem:[#allocation9 + $0x39]] }
  0xd9   : > { %v684_v13 = vmul.f32 %v682_v9, %v681_v10 }
  0xda   : > { %1668 = vrot.lane.b32.xlu1 %v2538_v52, %s3507_s28  ;;  %s3544_s28 = smov 112   ;;  %v472_v61 = vstv %s1893_s27  ;;  %s3511_s27 = smov 99   ;;  %v1001_v23 = vstv %s1927_s10 }
  0xdb   : > { %v473_v63 = vmul.f32 %v472_v61, %v2541_v53  ;;  %v1002_v28 = vmul.f32 %v1001_v23, %v2541_v53  ;;  %s2674_s10 = sld [smem:[#allocation9 + $0x19]] }
  0xdc   : > { %1588 = vrot.lane.b32.xlu0 %v2538_v52, %s2298_s25  ;;  %s3543_s25 = smov 93   ;;  %v570_v59 = vstv %s1899_s21  ;;  %s1913_s21 = sld [smem:[#allocation9 + $0x12]]  ;;  %v991_v19 = vstv %s1926_s19 }
  0xdd   : > { %v571_v62 = vmul.f32 %v570_v59, %v2541_v53  ;;  %v992_v22 = vmul.f32 %v991_v19, %v2541_v53  ;;  %s2669_s19 = sld [smem:[#allocation9 + $0x1e]] }
  0xde   : > { %1604 = vrot.lane.b32.xlu1 %v2538_v52, %s2301_s20  ;;  %s1905_s20 = sld [smem:[#allocation9 + $0xa]]  ;;  %v1183_v29 = vstv %s1940_s18  ;;  %s2676_s18 = sld [smem:[#allocation9 + $0x2b]] }
  0xdf   : > { %v1184_v33 = vmul.f32 %v1183_v29, %v2538_v52 }
  0xe0   : > { %1524 = vrot.lane.b32.xlu0 %v2538_v52, %s2300_s4 }
  0xe1   : > { %v780_v3 = vstv %s2674_s10  ;;  %s2711_s10 = sld [smem:[#allocation9 + $0x21]] }
  0xe2   : > { %1620 = vrot.lane.b32.xlu1 %v2538_v52, %s2303_s9  ;;  %v770_v12 = vstv %s1913_s21  ;;  %s2660_s21 = sld [smem:[#allocation9 + $0x1d]] }
  0xe3   : > { %v771_v15 = vmul.f32 %v770_v12, %v2541_v53 }
  0xe4   : > { %1684 = vrot.lane.b32.xlu0 %v2538_v52, %s2302_s5  ;;  %s2306_s5 = smov 115   ;;  %v661_v0 = vstv %s1905_s20  ;;  %s1920_s20 = sld [smem:[#allocation9 + $0x13]] }
  0xe5   : > { %v662_v2 = vmul.f32 %v661_v0, %v2541_v53 }
  0xe6   : > { %1716 = vrot.lane.b32.xlu1 %v2538_v52, %s3509_s29  ;;  %s1919_s29 = sld [smem:[#allocation9 + $0xc]] }
  0xe8   : > { %1700 = vrot.lane.b32.xlu0 %v2538_v52, %s3543_s25  ;;  %s1912_s25 = sld [smem:[#allocation9 + $0xb]]  ;;  %v482_v46 = vstv %s2660_s21  ;;  %s2691_s21 = sld [smem:[#allocation9 + $0x20]] }
  0xea   : > { %465 = vrot.lane.b32.xlu1 %v463_v56, %s3520_s6  ;;  %v889_v17 = vstv %s1920_s20  ;;  %s2665_s20 = sld [smem:[#allocation9 + $0x25]] }
  0xeb   : > { %v890_v20 = vmul.f32 %v889_v17, %v2541_v53 }
  0xec   : > { %455 = vrot.lane.b32.xlu0 %v453_v57, %s3544_s28  ;;  %v879_v14 = vstv %s1919_s29  ;;  %s2656_s29 = sld [smem:[#allocation9 + $0x24]]  ;;  %v590_v57 = vstv %s2669_s19  ;;  %s2701_s19 = sld [smem:[#allocation9 + $0x2d]] }
  0xed   : > { %v880_v18 = vmul.f32 %v879_v14, %v2541_v53 }
  0xee   : > { %373 = vrot.lane.b32.xlu1 %v2541_v53, %s2306_s5  ;;  %v760_v5 = vstv %s1912_s25  ;;  %s3518_s25 = smov 83  }
  0xef   : > { %v761_v8 = vmul.f32 %v760_v5, %v2541_v53 }
  0xf0   : > { %563 = vrot.lane.b32.xlu0 %v561_v60, %s3544_s28 }
  0xf2   : > { %573 = vrot.lane.b32.xlu1 %v571_v62, %s3520_s6  ;;  %v500_v41 = vstv %s2656_s29  ;;  %s2689_s29 = sld [smem:[#allocation9 + $0x1f]] }
  0xf4   : > { %475 = vrot.lane.b32.xlu0 %v473_v63, %s3542_s11 }
  0xf6   : > { %391 = vrot.lane.b32.xlu1 %v2541_v53, %s3511_s27  ;;  %s2680_s27 = sld [smem:[#allocation9 + $0x2c]] }
  0xf8   : > { %664 = vrot.lane.b32.xlu0 %v662_v2, %s3544_s28  ;;  %v693_v21 = vstv %s2689_s29  ;;  %s2721_s29 = sld [smem:[#allocation9 + $0x2e]] }
  0xfa   : > { %583 = vrot.lane.b32.xlu1 %v581_v4, %s3542_s11 }
  0xfc   : > { %674 = vrot.lane.b32.xlu0 %v672_v7, %s3520_s6  ;;  %v625_v9 = vstv %s2680_s27  ;;  %s2709_s27 = sld [smem:[#allocation9 + $0x1a]] }
  0xfe   : > { %763 = vrot.lane.b32.xlu1 %v761_v8, %s3544_s28  ;;  %v517_v8 = vstv %s2676_s18  ;;  %s2719_s18 = sld [smem:[#allocation9 + $0x27]] }
 0x100   : > { %408 = vrot.lane.b32.xlu0 %v2541_v53, %s3518_s25  ;;  %v608_v53 = vstv %s2665_s20  ;;  %s2699_s20 = sld [smem:[#allocation9 + $0x26]] }
 0x102   : > { %686 = vrot.lane.b32.xlu1 %v684_v13, %s3542_s11 }
 0x104   : > { %773 = vrot.lane.b32.xlu0 %v771_v15, %s3520_s6 }
 0x106   : > { %882 = vrot.lane.b32.xlu1 %v880_v18, %s3544_s28 }
 0x108   : > { %v2649_v24 = vpop.permute.xlu1 %1214  ;;  %892 = vrot.lane.b32.xlu0 %v890_v20, %s3520_s6 }
 0x10a   : > { %v484_v27 = vpop.permute.xlu0 %483  ;;  %994 = vrot.lane.b32.xlu1 %v992_v22, %s3544_s28  ;;  %v796_v22 = vstv %s2691_s21  ;;  %s2729_s21 = sld [smem:[#allocation9 + $0x1b]] }
 0x10b   : > { %v485_v34 = vrot.slane %v484_v27, 1  ;;  %v486_v35 = vrot.slane %v484_v27, 2 }
 0x10c   : > { %v592_v30 = vpop.permute.xlu1 %591  ;;  %541 = vrot.lane.b32.xlu0 %v540_v25, %s2303_s9 }
 0x10d   : > { %v593_v43 = vrot.slane %v592_v30, 1  ;;  %v594_v44 = vrot.slane %v592_v30, 2  ;;  %v488_v49 = vsel %vm487_vm3, %v485_v34, %v486_v35  ;;  %v709_v35 = vstv %s2699_s20  ;;  %s2731_s20 = sld [smem:[#allocation9 + $0x22]] }
 0x10e   : > { %v502_v32 = vpop.permute.xlu0 %501  ;;  %1004 = vrot.lane.b32.xlu1 %v1002_v28, %s3520_s6  ;;  %v490_v56 = vmul.f32 %v488_v49, %v482_v46  ;;  %v915_v49 = vstv %s2711_s10  ;;  %s3545_s10 = smov 82  }
 0x10f   : > { %v503_v36 = vrot.slane %v502_v32, 1  ;;  %v504_v38 = vrot.slane %v502_v32, 2  ;;  %v596_v58 = vsel %vm595_vm5, %v593_v43, %v594_v44 }
 0x110   : > { %v519_v39 = vpop.permute.xlu1 %518  ;;  %642 = vrot.lane.b32.xlu0 %v641_v31, %s2300_s4  ;;  %v598_v7 = vmul.f32 %v596_v58, %v590_v57 }
 0x111   : > { %v506_v42 = vsel %vm505_vm2, %v503_v36, %v504_v38  ;;  %v520_v59 = vrot.slane %v519_v39, 1  ;;  %v521_v60 = vrot.slane %v519_v39, 2  ;;  %v725_v36 = vstv %s2701_s19  ;;  %s2741_s19 = sld [smem:[#allocation9 + $0x28]] }
 0x112   : > { %v610_v45 = vpop.permute.xlu0 %609  ;;  %1186 = vrot.lane.b32.xlu1 %v1184_v33, %s3544_s28  ;;  %v508_v51 = vmul.f32 %v506_v42, %v500_v41 }
 0x113   : > { %v611_v47 = vrot.slane %v610_v45, 1  ;;  %v612_v48 = vrot.slane %v610_v45, 2  ;;  %v523_v12 = vsel %vm522_vm7, %v520_v59, %v521_v60 }
 0x114   : > { %v695_v50 = vpop.permute.xlu1 %694  ;;  %741 = vrot.lane.b32.xlu0 %v740_v40, %s3542_s11  ;;  %v525_v19 = vmul.f32 %v523_v12, %v517_v8 }
 0x115   : > { %v614_v54 = vsel %vm613_vm4, %v611_v47, %v612_v48  ;;  %v696_v10 = vrot.slane %v695_v50, 1  ;;  %v697_v11 = vrot.slane %v695_v50, 2  ;;  %v899_v48 = vstv %s2709_s27  ;;  %s2743_s27 = sld [smem:[#allocation9 + $0x40]] }
 0x116   : > { %v782_v55 = vpop.permute.xlu0 %781  ;;  %510 = vrot.lane.b32.xlu1 %v508_v51, %s2303_s9  ;;  %v616_v0 = vmul.f32 %v614_v54, %v608_v53 }
 0x117   : > { %v783_v61 = vrot.slane %v782_v55, 1  ;;  %v784_v62 = vrot.slane %v782_v55, 2  ;;  %v698_v27 = vsel %vm344_vm9, %v696_v10, %v697_v11  ;;  %v1011_v10 = vstv %s2729_s21  ;;  %s2770_s21 = sld [smem:[#allocation9 + $0x2f]] }
 0x118   : > { %v627_v63 = vpop.permute.xlu1 %626  ;;  %492 = vrot.lane.b32.xlu0 %v490_v56, %s2303_s9  ;;  %v700_v33 = vmul.f32 %v698_v27, %v693_v21  ;;  %v1027_v11 = vstv %s2731_s20  ;;  %v932_v21 = vstv %s2741_s19  ;;  %s2772_s20 = sld [smem:[#allocation9 + $0x47]]  ;;  %s2784_s19 = sld [smem:[#allocation9 + $0x3b]] }
 0x119   : > { %v628_v1 = vrot.slane %v627_v63, 1  ;;  %v629_v2 = vrot.slane %v627_v63, 2  ;;  %v785_v4 = vsel %vm551_vm6, %v783_v61, %v784_v62  ;;  %v813_v61 = vstv %s2719_s18  ;;  %s2752_s18 = sld [smem:[#allocation9 + $0x3a]] }
 0x11a   : > { %v711_v5 = vpop.permute.xlu0 %710  ;;  %618 = vrot.lane.b32.xlu1 %v616_v0, %s2300_s4  ;;  %v787_v15 = vmul.f32 %v785_v4, %v780_v3  ;;  %v830_v62 = vstv %s2721_s29  ;;  %s2763_s29 = sld [smem:[#allocation9 + $0x29]] }
 0x11b   : > { %v631_v13 = vsel %vm630_vm8, %v628_v1, %v629_v2  ;;  %v712_v23 = vrot.slane %v711_v5, 1  ;;  %v713_v25 = vrot.slane %v711_v5, 2 }
 0x11c   : > { %v798_v14 = vpop.permute.xlu1 %797  ;;  %600 = vrot.lane.b32.xlu0 %v598_v7, %s2300_s4  ;;  %v633_v20 = vmul.f32 %v631_v13, %v625_v9 }
 0x11d   : > { %v799_v16 = vrot.slane %v798_v14, 1  ;;  %v800_v17 = vrot.slane %v798_v14, 2  ;;  %v714_v40 = vsel %vm355_vm11, %v712_v23, %v713_v25  ;;  %v1193_v23 = vstv %s2743_s27  ;;  %s1948_s27 = sld [smem:[#allocation9 + $0x41]] }
 0x11e   : > { %v901_v18 = vpop.permute.xlu0 %900  ;;  %789 = vrot.lane.b32.xlu1 %v787_v15, %s3539_s8  ;;  %v716_v46 = vmul.f32 %v714_v40, %v709_v35 }
 0x11f   : > { %v802_v28 = vsel %vm801_vm10, %v799_v16, %v800_v17  ;;  %v902_v38 = vrot.slane %v901_v18, 1  ;;  %v903_v39 = vrot.slane %v901_v18, 2 }
 0x120   : > { %v727_v29 = vpop.permute.xlu1 %726  ;;  %527 = vrot.lane.b32.xlu0 %v525_v19, %s2303_s9  ;;  %v804_v34 = vmul.f32 %v802_v28, %v796_v22 }
 0x121   : > { %v728_v30 = vrot.slane %v727_v29, 1  ;;  %v729_v31 = vrot.slane %v727_v29, 2  ;;  %v904_v53 = vsel %vm652_vm13, %v902_v38, %v903_v39  ;;  %v1194_v29 = vmul.f32 %v1193_v23, %v2538_v52 }
 0x122   : > { %v815_v32 = vpop.permute.xlu0 %814  ;;  %635 = vrot.lane.b32.xlu1 %v633_v20, %s2300_s4  ;;  %v906_v59 = vmul.f32 %v904_v53, %v899_v48  ;;  %v2106_v20 = vld [vmem:[#allocation10 + $0x4] ss:$8 sps:$4 sm:$0x77]  }
 0x123   : > { %v730_v41 = vsel %vm3513_vm12, %v728_v30, %v729_v31  ;;  %v816_v50 = vrot.slane %v815_v32, 1  ;;  %v817_v51 = vrot.slane %v815_v32, 2  ;;  %vm3515_vm12 = vcmask 891904  }
 0x124   : > { %v917_v42 = vpop.permute.xlu1 %916  ;;  %702 = vrot.lane.b32.xlu0 %v700_v33, %s3542_s11  ;;  %v732_v47 = vmul.f32 %v730_v41, %v725_v36  ;;  %v852_v30 = vrot.slane %v2106_v20, %v2524_v37 }
 0x125   : > { %v918_v43 = vrot.slane %v917_v42, 1  ;;  %v919_v44 = vrot.slane %v917_v42, 2  ;;  %v819_v1 = vsel %vm818_vm15, %v816_v50, %v817_v51  ;;  %v1044_v42 = vstv %s2763_s29  ;;  %s1955_s29 = sld [smem:[#allocation9 + $0x42]] }
 0x126   : > { %v1013_v45 = vpop.permute.xlu0 %1012  ;;  %806 = vrot.lane.b32.xlu1 %v804_v34, %s3539_s8  ;;  %v821_v8 = vmul.f32 %v819_v1, %v813_v61  ;;  %v1273_v34 = vstv %s2752_s18  ;;  %v2782_v36 = vrot.slane %v852_v30, %v2524_v37  ;;  %s1943_s18 = sld [smem:[#allocation9 + $0x4e]]  ;;  %v1217_v1 = vrot.slane %v2649_v24, 2 }
 0x127   : > { %v921_v54 = vsel %vm3512_vm14, %v918_v43, %v919_v44  ;;  %v1014_v63 = vrot.slane %v1013_v45, 1  ;;  %v1015_v0 = vrot.slane %v1013_v45, 2  ;;  %vm3522_vm14 = vcmask 1022976  }
 0x128   : > { %v832_v55 = vpop.permute.xlu1 %831  ;;  %718 = vrot.lane.b32.xlu0 %v716_v46, %s3542_s11  ;;  %v923_v60 = vmul.f32 %v921_v54, %v915_v49  ;;  %v1274_v41 = vmul.f32 %v1273_v34, %v2538_v52  ;;  %v949_v45 = vstv %s2770_s21  ;;  %v1363_v54 = vstv %s2784_s19  ;;  %s3546_s21 = smov 99   ;;  %s1961_s19 = sld [smem:[#allocation9 + $0x3c]] }
 0x129   : > { %v833_v56 = vrot.slane %v832_v55, 1  ;;  %v834_v57 = vrot.slane %v832_v55, 2  ;;  %v1016_v14 = vsel %vm3522_vm14, %v1014_v63, %v1015_v0  ;;  %v964_v63 = vcombine.high %v852_v30, %v852_v30 }
 0x12a   : > { %v934_v58 = vpop.permute.xlu0 %933  ;;  %734 = vrot.lane.b32.xlu1 %v732_v47, %s3542_s11  ;;  %v1018_v18 = vmul.f32 %v1016_v14, %v1011_v10  ;;  %v1203_v47 = vstv %s2772_s20  ;;  %v1216_v0 = vrot.slane %v2649_v24, 1  ;;  %s1949_s20 = sld [smem:[#allocation9 + $0x48]] }
 0x12b   : > { %v835_v2 = vsel %vm3514_vm0, %v833_v56, %v834_v57  ;;  %v935_v12 = vrot.slane %v934_v58, 1  ;;  %v936_v13 = vrot.slane %v934_v58, 2  ;;  %vm3516_vm0 = vcmask 769024  }
 0x12c   : > { %v1029_v3 = vpop.permute.xlu1 %1028  ;;  %908 = vrot.lane.b32.xlu0 %v906_v59, %s3545_s10  ;;  %v837_v9 = vmul.f32 %v835_v2, %v830_v62  ;;  %v1204_v53 = vmul.f32 %v1203_v47, %v2538_v52  ;;  %v1283_v58 = vstv %s1948_s27  ;;  %v1218_v10 = vsel %vm487_vm3, %v1216_v0, %v1217_v1  ;;  %s2842_s27 = sld [smem:[#allocation9 + $0x4f]] }
 0x12d   : > { %v1030_v4 = vrot.slane %v1029_v3, 1  ;;  %v1031_v5 = vrot.slane %v1029_v3, 2  ;;  %v938_v22 = vsel %vm3516_vm0, %v935_v12, %v936_v13  ;;  %vm495_vm0 = vcmask 637952  }
 0x12e   : > { %v951_v7 = vpop.permute.xlu0 %950  ;;  %925 = vrot.lane.b32.xlu1 %v923_v60, %s3545_s10  ;;  %v940_v28 = vmul.f32 %v938_v22, %v932_v21  ;;  %v1364_v60 = vmul.f32 %v1363_v54, %v2538_v52  ;;  %v1284_v62 = vmul.f32 %v1283_v58, %v2538_v52  ;;  %v1455_v20 = vstv %s1961_s19  ;;  %s2891_s19 = sld [smem:[#allocation9 + $0x50]] }
 0x12f   : > { %v1033_v15 = vsel %vm3515_vm12, %v1030_v4, %v1031_v5  ;;  %vm3517_vm12 = vcmask 760832   ;;  %v952_v38 = vrot.slane %v951_v7, 1  ;;  %v953_v39 = vrot.slane %v951_v7, 2 }
 0x130   : > { %v1046_v16 = vpop.permute.xlu1 %1045  ;;  %823 = vrot.lane.b32.xlu0 %v821_v8, %s3539_s8  ;;  %v1035_v19 = vmul.f32 %v1033_v15, %v1027_v11  ;;  %v971_v8 = vrot.slane %v964_v63, %v2524_v37  ;;  %v1373_v11 = vstv %s1955_s29  ;;  %v1293_v14 = vstv %s1949_s20  ;;  %s2859_s29 = sld [smem:[#allocation9 + $0x49]]  ;;  %s2876_s20 = sld [smem:[#allocation9 + $0x3d]] }
 0x131   : > { %v1047_v32 = vrot.slane %v1046_v16, 1  ;;  %v1048_v33 = vrot.slane %v1046_v16, 2  ;;  %v954_v46 = vsel %vm495_vm0, %v952_v38, %v953_v39  ;;  %v1374_v37 = vmul.f32 %v1373_v11, %v2538_v52 }
 0x132   : > { %v2754_v17 = vpop.permute.xlu0 %1062  ;;  %839 = vrot.lane.b32.xlu1 %v837_v9, %s3539_s8  ;;  %v956_v51 = vmul.f32 %v954_v46, %v949_v45  ;;  %v1213_v9 = vstv %s1943_s18  ;;  %s2850_s18 = sld [smem:[#allocation9 + $0x43]]  ;;  %v1076_v21 = vcombine.high %v2782_v36, %v2782_v36  ;;  %vm3548_vm3 = vcmask 900096  }
 0x133   : > { %v1050_v43 = vsel %vm3517_vm12, %v1047_v32, %v1048_v33  ;;  %v1064_v56 = vrot.slane %v2754_v17, 1  ;;  %v1065_v57 = vrot.slane %v2754_v17, 2  ;;  %vm385_vm12 = vcmask 629760  }
 0x134   : > { %v2760_v25 = vpop.permute.xlu1 %1304  ;;  %1020 = vrot.lane.b32.xlu0 %v1018_v18, %s3518_s25  ;;  %v1052_v49 = vmul.f32 %v1050_v43, %v1044_v42  ;;  %v1220_v13 = vmul.f32 %v1218_v10, %v1213_v9  ;;  %v1294_v17 = vmul.f32 %v1293_v14, %v2538_v52  ;;  %v1303_v32 = vstv %s2842_s27  ;;  %s2897_s27 = sld [smem:[#allocation9 + $0x56]] }
 0x135   : > { %v1066_v3 = vsel %vm385_vm12, %v1064_v56, %v1065_v57  ;;  %v1306_v18 = vrot.slane %v2760_v25, 1 }
 0x136   : > { %v2765_v27 = vpop.permute.xlu0 %1230  ;;  %1037 = vrot.lane.b32.xlu1 %v1035_v19, %s3518_s25  ;;  %v1307_v19 = vrot.slane %v2760_v25, 2  ;;  %v1456_v25 = vmul.f32 %v1455_v20, %v2538_v52  ;;  %v1383_v45 = vstv %s2859_s29  ;;  %v1551_v58 = vstv %s2876_s20  ;;  %s2920_s29 = sld [smem:[#allocation9 + $0x5d]]  ;;  %s2945_s20 = sld [smem:[#allocation9 + $0x57]] }
 0x137   : > { %v1232_v23 = vrot.slane %v2765_v27, 1 }
 0x138   : > { %v2774_v31 = vpop.permute.xlu1 %1320  ;;  %942 = vrot.lane.b32.xlu0 %v940_v28, %s3545_s10  ;;  %v1233_v28 = vrot.slane %v2765_v27, 2  ;;  %v1308_v30 = vsel %vm595_vm5, %v1306_v18, %v1307_v19  ;;  %vm3551_vm5 = vcmask 646144  }
 0x139   : > { %v1310_v39 = vmul.f32 %v1308_v30, %v1303_v32  ;;  %v1323_v63 = vrot.slane %v2774_v31, 2 }
 0x13a   : > { %v2778_v35 = vpop.permute.xlu0 %1246  ;;  %1196 = vrot.lane.b32.xlu1 %v1194_v29, %s3520_s6  ;;  %v1234_v27 = vsel %vm505_vm2, %v1232_v23, %v1233_v28  ;;  %vm3547_vm2 = vcmask 654336  }
 0x13b   : > { %v1248_v42 = vrot.slane %v2778_v35, 1  ;;  %v1249_v43 = vrot.slane %v2778_v35, 2 }
 0x13c   : > { %v2786_v40 = vpop.permute.xlu1 %1476  ;;  %1130 = vrot.lane.b32.xlu0 %v2538_v52, %s2306_s5  ;;  %s2803_s5 = sld [smem:[#allocation9 + $0x30]] }
 0x13d   : > { %v1250_v54 = vsel %vm522_vm7, %v1248_v42, %v1249_v43  ;;  %v1478_v9 = vrot.slane %v2786_v40, 1  ;;  %v1479_v10 = vrot.slane %v2786_v40, 2 }
 0x13e   : > { %v2793_v44 = vpop.permute.xlu0 %1396  ;;  %860 = vrot.lane.b32.xlu1 %v2782_v36, %s3539_s8  ;;  %v1465_v36 = vstv %s2850_s18  ;;  %s2914_s18 = sld [smem:[#allocation9 + $0x4a]] }
 0x13f   : > { %v1398_v56 = vrot.slane %v2793_v44, 1  ;;  %v1399_v57 = vrot.slane %v2793_v44, 2  ;;  %v1552_v44 = vmul.f32 %v1551_v58, %v2538_v52  ;;  %v1480_v20 = vsel %vm551_vm6, %v1478_v9, %v1479_v10  ;;  %v3010_v9 = vld [vmem:[#allocation4] ss:$2 sm:$0xf] }
 0x140   : > { %v2800_v48 = vpop.permute.xlu1 %1412  ;;  %1276 = vrot.lane.b32.xlu0 %v1274_v41, %s3544_s28  ;;  %v1384_v41 = vrot.slane %v2538_v52, 1 }
 0x142   : > { %v2805_v50 = vpop.permute.xlu0 %1336  ;;  %1054 = vrot.lane.b32.xlu1 %v1052_v49, %s3518_s25  ;;  %v1061_v2 = vstv %s2803_s5  ;;  %s2848_s5 = sld [smem:[#allocation9 + $0x55]]  ;;  %v1466_v49 = vmul.f32 %v1465_v36, %v2538_v52  ;;  %v1386_v35 = vmul.f32 %v1384_v41, %v1383_v45  ;;  %v1414_v36 = vrot.slane %v2800_v48, 1 }
 0x143   : > { %v1068_v7 = vmul.f32 %v1066_v3, %v1061_v2  ;;  %v1400_v2 = vsel %vm344_vm9, %v1398_v56, %v1399_v57  ;;  %v1395_v3 = vstv %s2891_s19  ;;  %s2949_s19 = sld [smem:[#allocation9 + $0x45]] }
 0x144   : > { %v2810_v55 = vpop.permute.xlu1 %1572  ;;  %958 = vrot.lane.b32.xlu0 %v956_v51, %s3545_s10  ;;  %v1402_v14 = vmul.f32 %v1400_v2, %v1395_v3  ;;  %v3001_v2 = vld [vmem:[#allocation4 + $0x1] ss:$2 sm:$0xf] }
 0x146   : > { %v2815_v59 = vpop.permute.xlu0 %1492  ;;  %1206 = vrot.lane.b32.xlu1 %v1204_v53, %s3542_s11 }
 0x147   : > { %v1495_v30 = vrot.slane %v2815_v59, 2 }
 0x148   : > { %v2819_v61 = vpop.permute.xlu1 %1508  ;;  %1146 = vrot.lane.b32.xlu0 %v2538_v52, %s3546_s21  ;;  %s2872_s21 = sld [smem:[#allocation9 + $0x5c]]  ;;  %v1229_v34 = vstv %s2848_s5 }
 0x149   : > { %v1236_v47 = vmul.f32 %v1234_v27, %v1229_v34  ;;  %s2899_s5 = sld [smem:[#allocation9 + $0x44]]  ;;  %v1510_v57 = vrot.slane %v2819_v61, 1  ;;  %v1511_v58 = vrot.slane %v2819_v61, 2 }
 0x14a   : > { %v2828_v4 = vpop.permute.xlu0 %1428  ;;  %1366 = vrot.lane.b32.xlu1 %v1364_v60, %s3544_s28 }
 0x14c   : > { %v2831_v5 = vpop.permute.xlu1 %1668  ;;  %1286 = vrot.lane.b32.xlu0 %v1284_v62, %s3520_s6  ;;  %v1322_v62 = vrot.slane %v2774_v31, 1 }
 0x14e   : > { %v2836_v24 = vpop.permute.xlu0 %1588  ;;  %1070 = vrot.lane.b32.xlu1 %v1068_v7, %s3518_s25  ;;  %v1245_v53 = vstv %s2872_s21  ;;  %s2924_s21 = sld [smem:[#allocation9 + $0x3e]]  ;;  %v1319_v7 = vstv %s2897_s27  ;;  %s2959_s27 = sld [smem:[#allocation9 + $0x5]] }
 0x14f   : > { %v1252_v1 = vmul.f32 %v1250_v54, %v1245_v53  ;;  %v1561_v11 = vstv %s2899_s5  ;;  %s2966_s5 = sld [smem:[#allocation9 + $0x4b]]  ;;  %v1657_v53 = vstv %s2949_s19 }
 0x150   : > { %v2839_v12 = vpop.permute.xlu1 %1604  ;;  %972 = vrot.lane.b32.xlu0 %v971_v8, %s3545_s10  ;;  %v1324_v8 = vsel %vm613_vm4, %v1322_v62, %v1323_v63  ;;  %v1562_v40 = vmul.f32 %v1561_v11, %v2538_v52  ;;  %v1430_v63 = vrot.slane %v2828_v4, 1  ;;  %v1658_v3 = vmul.f32 %v3001_v2, %v1657_v53  ;;  %s3042_s19 = sld [smem:[#allocation9 + $0x53]] }
 0x151   : > { %v1326_v19 = vmul.f32 %v1324_v8, %v1319_v7  ;;  %v1670_v8 = vrot.slane %v2831_v5, 1  ;;  %vm3549_vm4 = vcmask 769024  }
 0x152   : > { %v2844_v15 = vpop.permute.xlu0 %1524  ;;  %1222 = vrot.lane.b32.xlu1 %v1220_v13, %s2303_s9 }
 0x154   : > { %v2852_v16 = vpop.permute.xlu1 %1620  ;;  %1162 = vrot.lane.b32.xlu0 %v2538_v52, %s3518_s25  ;;  %v1647_v32 = vstv %s2924_s21  ;;  %s2982_s21 = sld [smem:[#allocation9 + $0x5e]]  ;;  %v875_v62 = vstv %s2959_s27  ;;  %s3047_s27 = sld [smem:[#allocation9 + $0x1]] }
 0x155   : > { %v1648_v42 = vmul.f32 %v1647_v32, %v2538_v52  ;;  %v1574_v52 = vrot.slane %v2810_v55, 1  ;;  %v1571_v7 = vstv %s2966_s5  ;;  %v876_v10 = vmul.f32 %v3010_v9, %v875_v62  ;;  %s3050_s5 = sld [smem:[#allocation9 + $0x2]] }
 0x156   : > { %v2863_v22 = vpop.permute.xlu0 %1684  ;;  %1376 = vrot.lane.b32.xlu1 %v1374_v37, %s3520_s6  ;;  %v1338_v37 = vrot.slane %v2805_v50, 1 }
 0x158   : > { %v2868_v29 = vpop.permute.xlu1 %1716  ;;  %1296 = vrot.lane.b32.xlu0 %v1294_v17, %s3542_s11  ;;  %v1339_v17 = vrot.slane %v2805_v50, 2  ;;  %v1335_v50 = vstv %s2920_s29  ;;  %s2976_s29 = sld [smem:[#allocation9 + $0x58]] }
 0x15a   : > { %v2878_v33 = vpop.permute.xlu0 %1700  ;;  %1077 = vrot.lane.b32.xlu1 %v1076_v21, %s3518_s25  ;;  %v1475_v21 = vstv %s2914_s18  ;;  %v1340_v28 = vsel %vm630_vm8, %v1338_v37, %v1339_v17  ;;  %s2974_s18 = sld [smem:[#allocation9 + $0x6]]  ;;  %s2984_s25 = sld [smem:[#allocation9 + $0x4c]] }
 0x15b   : > { %v1482_v34 = vmul.f32 %v1480_v20, %v1475_v21  ;;  %v1427_v21 = vstv %s2982_s21  ;;  %s3061_s21 = sld [smem:[#allocation9 + $0x3]] }
 0x15c   : > { %v2884_v38 = vpop.permute.xlu1 %465  ;;  %1458 = vrot.lane.b32.xlu0 %v1456_v25, %s3544_s28  ;;  %v1494_v25 = vrot.slane %v2815_v59, 1  ;;  %v1342_v59 = vmul.f32 %v1340_v28, %v1335_v50  ;;  %v1590_v28 = vrot.slane %v2836_v24, 1 }
 0x15e   : > { %1312 = vrot.lane.b32.xlu1 %v1310_v39, %s2300_s4  ;;  %v2894_v46 = vpop.permute.xlu0 %455  ;;  %v1415_v39 = vrot.slane %v2800_v48, 2  ;;  %v1496_v43 = vsel %vm801_vm10, %v1494_v25, %v1495_v30  ;;  %v1591_v25 = vrot.slane %v2836_v24, 2  ;;  %vm3552_vm10 = vcmask 891904  }
 0x160   : > { %v2901_v51 = vpop.permute.xlu1 %373  ;;  %1238 = vrot.lane.b32.xlu0 %v1236_v47, %s2303_s9  ;;  %v1411_v47 = vstv %s2945_s20  ;;  %v987_v17 = vstv %s2974_s18  ;;  %v1667_v50 = vstv %s2984_s25  ;;  %s3023_s20 = sld [smem:[#allocation9 + $0x5f]]  ;;  %s3034_s25 = sld [smem:[#allocation9 + $0x60]] }
 0x161   : > { %s3054_s18 = sld [smem:[#allocation9 + $0x5a]] }
 0x162   : > { %1468 = vrot.lane.b32.xlu1 %v1466_v49, %s3520_s6  ;;  %v2910_v60 = vpop.permute.xlu0 %563  ;;  %v1416_v49 = vsel %vm355_vm11, %v1414_v36, %v1415_v39  ;;  %v988_v39 = vmul.f32 %v3010_v9, %v987_v17 }
 0x164   : > { %v2916_v0 = vpop.permute.xlu1 %573  ;;  %1388 = vrot.lane.b32.xlu0 %v1386_v35, %s3542_s11  ;;  %v1575_v35 = vrot.slane %v2810_v55, 2  ;;  %v1418_v55 = vmul.f32 %v1416_v49, %v1411_v47 }
 0x166   : > { %1254 = vrot.lane.b32.xlu1 %v1252_v1, %s2303_s9  ;;  %v2927_v31 = vpop.permute.xlu0 %475  ;;  %s2939_s9 = sld [smem:[#allocation9 + $0x51]]  ;;  %v1431_v1 = vrot.slane %v2828_v4, 2  ;;  %v1576_v61 = vsel %vm652_vm13, %v1574_v52, %v1575_v35  ;;  %v1671_v4 = vrot.slane %v2831_v5, 2 }
 0x167   : > { %v1578_v5 = vmul.f32 %v1576_v61, %v1571_v7  ;;  %v1622_v61 = vrot.slane %v2852_v16, 1 }
 0x168   : > { %v2934_v13 = vpop.permute.xlu1 %391  ;;  %1554 = vrot.lane.b32.xlu0 %v1552_v44, %s3544_s28 }
 0x16a   : > { %1404 = vrot.lane.b32.xlu1 %v1402_v14, %s3542_s11  ;;  %v2942_v18 = vpop.permute.xlu0 %664  ;;  %v1512_v14 = vsel %vm818_vm15, %v1510_v57, %v1511_v58  ;;  %v1527_v57 = vrot.slane %v2844_v15, 2  ;;  %vm377_vm15 = vcmask 941056  }
 0x16c   : > { %v2951_v23 = vpop.permute.xlu1 %583  ;;  %1328 = vrot.lane.b32.xlu0 %v1326_v19, %s2300_s4  ;;  %v1491_v45 = vstv %s2939_s9  ;;  %s3014_s9 = sld [smem:[#allocation9 + $0x59]]  ;;  %v1507_v19 = vstv %s2976_s29 }
 0x16d   : > { %v1498_v56 = vmul.f32 %v1496_v43, %v1491_v45  ;;  %v1606_v43 = vrot.slane %v2839_v12, 1  ;;  %v1607_v45 = vrot.slane %v2839_v12, 2  ;;  %v1526_v12 = vrot.slane %v2844_v15, 1  ;;  %s3059_s29 = sld [smem:[#allocation9 + $0x61]] }
 0x16e   : > { %1564 = vrot.lane.b32.xlu1 %v1562_v40, %s3520_s6  ;;  %v2962_v27 = vpop.permute.xlu0 %674  ;;  %v1432_v40 = vsel %vm3547_vm2, %v1430_v63, %v1431_v1  ;;  %v1623_v15 = vrot.slane %v2852_v16, 2  ;;  %vm3553_vm2 = vcmask 760832  }
 0x16f   : > { %v1434_v35 = vmul.f32 %v1432_v40, %v1427_v21  ;;  %v1619_v21 = vstv %s3034_s25  ;;  %s3096_s25 = sld [smem:[#allocation9 + $0x15]] }
 0x170   : > { %v2968_v41 = vpop.permute.xlu1 %763  ;;  %1484 = vrot.lane.b32.xlu0 %v1482_v34, %s3539_s8  ;;  %v1672_v34 = vsel %vm3522_vm14, %v1670_v8, %v1671_v4 }
 0x171   : > { %v1674_v1 = vmul.f32 %v1672_v34, %v1667_v50  ;;  %v448_v34 = vstv %s3047_s27  ;;  %s1936_s27 = sld [smem:[#allocation9 + $0x4d]] }
 0x172   : > { %1344 = vrot.lane.b32.xlu1 %v1342_v59, %s2300_s4  ;;  %v2979_v48 = vpop.permute.xlu0 %408  ;;  %s3004_s4 = sld [smem:[#allocation9 + $0x52]] }
 0x174   : > { %v2990_v54 = vpop.permute.xlu1 %686  ;;  %1650 = vrot.lane.b32.xlu0 %v1648_v42, %s3544_s28  ;;  %v1514_v42 = vmul.f32 %v1512_v14, %v1507_v19  ;;  %v1686_v14 = vrot.slane %v2863_v22, 1 }
 0x176   : > { %1500 = vrot.lane.b32.xlu1 %v1498_v56, %s3539_s8  ;;  %v2999_v44 = vpop.permute.xlu0 %773  ;;  %v1592_v56 = vsel %vm3548_vm3, %v1590_v28, %v1591_v25  ;;  %v1683_v25 = vstv %s3042_s19  ;;  %s3111_s19 = sld [smem:[#allocation9 + $0x38]]  ;;  %vm395_vm3 = vcmask 809984  }
 0x178   : > { %v883_v11 = vpop.permute.xlu1 %882  ;;  %1420 = vrot.lane.b32.xlu0 %v1418_v55, %s3542_s11  ;;  %v1587_v53 = vstv %s3004_s4  ;;  %v1603_v55 = vstv %s3014_s9  ;;  %s3550_s4 = smov 83   ;;  %s3071_s9 = sld [smem:[#allocation9 + $0xe]] }
 0x179   : > { %v884_v37 = vrot.slane %v883_v11, 1  ;;  %v1594_v4 = vmul.f32 %v1592_v56, %v1587_v53 }
 0x17a   : > { %1660 = vrot.lane.b32.xlu1 %v1658_v3, %s3520_s6  ;;  %v893_v20 = vpop.permute.xlu0 %892  ;;  %v1608_v3 = vsel %vm3549_vm4, %v1606_v43, %v1607_v45  ;;  %s3073_s6 = sld [smem:[#allocation9 + $0x1c]]  ;;  %v457_v43 = vrot.slane %v2894_v46, 1  ;;  %v1715_v45 = vstv %s3059_s29  ;;  %vm412_vm4 = vcmask 678912   ;;  %s3278_s29 = sld [smem:[#allocation9 + $0x5b]] }
 0x17b   : > { %v885_v30 = vsel %vm344_vm9, %v883_v11, %v884_v37  ;;  %v894_v32 = vrot.slane %v893_v20, 1  ;;  %v1528_v11 = vsel %vm3551_vm5, %v1526_v12, %v1527_v57  ;;  %v1687_v37 = vrot.slane %v2863_v22, 2 }
 0x17c   : > { %v887_v36 = vadd.f32 %v885_v30, %v876_v10  ;;  %v995_v59 = vpop.permute.xlu1 %994  ;;  %1580 = vrot.lane.b32.xlu0 %v1578_v5, %s3545_s10  ;;  %v1523_v10 = vstv %s3023_s20  ;;  %v1610_v40 = vmul.f32 %v1608_v3, %v1603_v55  ;;  %v1718_v22 = vrot.slane %v2868_v29, 1  ;;  %s3084_s20 = sld [smem:[#allocation9 + $0x7]] }
 0x17d   : > { %v895_v47 = vsel %vm355_vm11, %v893_v20, %v894_v32  ;;  %v996_v24 = vrot.slane %v995_v59, 1  ;;  %v1624_v20 = vsel %vm495_vm0, %v1622_v61, %v1623_v15  ;;  %v1719_v5 = vrot.slane %v2868_v29, 2 }
 0x17e   : > { %v3036_v49 = vadd.f32 %v895_v47, %v887_v36  ;;  %1516 = vrot.lane.b32.xlu1 %v1514_v42, %s3539_s8  ;;  %v3039_v52 = vpop.permute.xlu0 %541  ;;  %v1530_v28 = vmul.f32 %v1528_v11, %v1523_v10  ;;  %v1688_v30 = vsel %vm3552_vm10, %v1686_v14, %v1687_v37  ;;  %v1702_v32 = vrot.slane %v2878_v33, 1 }
 0x17f   : > { %v997_v58 = vsel %vm344_vm9, %v995_v59, %v996_v24  ;;  %v1703_v29 = vrot.slane %v2878_v33, 2  ;;  %v556_v36 = vstv %s3050_s5  ;;  %v1626_v59 = vmul.f32 %v1624_v20, %v1619_v21  ;;  %s1937_s5 = sld [smem:[#allocation9 + $0x54]] }
 0x180   : > { %v999_v62 = vadd.f32 %v997_v58, %v988_v39  ;;  %v1005_v63 = vpop.permute.xlu1 %1004  ;;  %1436 = vrot.lane.b32.xlu0 %v1434_v35, %s3542_s11  ;;  %v1720_v42 = vsel %vm385_vm12, %v1718_v22, %v1719_v5  ;;  %v1699_v47 = vstv %s3054_s18  ;;  %v449_v33 = vmul.f32 %v3010_v9, %v448_v34  ;;  %s2309_s18 = smov 124  }
 0x181   : > { %v1006_v7 = vrot.slane %v1005_v63, 1  ;;  %v657_v24 = vstv %s3061_s21  ;;  %v1690_v53 = vmul.f32 %v1688_v30, %v1683_v25  ;;  %v1704_v56 = vsel %vm3553_vm2, %v1702_v32, %v1703_v29  ;;  %s3284_s21 = sld [smem:[#allocation9 + $0x32]] }
 0x182   : > { %1676 = vrot.lane.b32.xlu1 %v1674_v1, %s3550_s4  ;;  %v3064_v8 = vpop.permute.xlu0 %642  ;;  %v557_v12 = vmul.f32 %v3010_v9, %v556_v36  ;;  %v349_v57 = vstv %s3071_s9  ;;  %v371_v58 = vstv %s3073_s6  ;;  %v1722_v55 = vmul.f32 %v1720_v42, %v1715_v45  ;;  %s3142_s6 = sld [smem:[#allocation9 + $0x3f]]  ;;  %s1946_s9 = sld [smem:[#allocation9 + $0x33]] }
 0x183   : > { %v1007_v16 = vsel %vm355_vm11, %v1005_v63, %v1006_v7  ;;  %v376_v63 = vrot.slane %v2901_v51, 2  ;;  %v458_v3 = vsel %vm344_vm9, %v2894_v46, %v457_v43  ;;  %v565_v61 = vrot.slane %v2910_v60, 1 }
 0x184   : > { %v3075_v17 = vadd.f32 %v1007_v16, %v999_v62  ;;  %v3077_v19 = vpop.permute.xlu1 %1186  ;;  %1596 = vrot.lane.b32.xlu0 %v1594_v4, %s3545_s10  ;;  %v375_v62 = vrot.slane %v2901_v51, 1  ;;  %v3126_v15 = vmul.f32 %v3010_v9, %v657_v24  ;;  %v338_v7 = vstv %s3084_s20  ;;  %s2311_s20 = smov 122  }
 0x185   : > { %v1706_v4 = vmul.f32 %v1704_v56, %v1699_v47  ;;  %v350_v10 = vmul.f32 %v3010_v9, %v349_v57  ;;  %v390_v11 = vstv %s3090_s0  ;;  %v467_v14 = vrot.slane %v2884_v38, 1  ;;  %s3554_s0 = smov 96  }
 0x186   : > { %1612 = vrot.lane.b32.xlu1 %v1610_v40, %s3545_s10  ;;  %v3087_v50 = vpop.permute.xlu0 %741  ;;  %v477_v37 = vrot.slane %v2927_v31, 1  ;;  %v360_v16 = vstv %s3096_s25  ;;  %v407_v46 = vstv %s3098_s1  ;;  %v460_v40 = vadd.f32 %v458_v3, %v449_v33  ;;  %s3163_s1 = sld [smem:[#allocation9 + $0x4]] }
 0x187   : > { %v378_v20 = vsel %vm377_vm15, %v375_v62, %v376_v63  ;;  %v575_v22 = vrot.slane %v2916_v0, 1  ;;  %v339_v21 = vmul.f32 %v3010_v9, %v338_v7  ;;  %v410_v25 = vrot.slane %v2979_v48, 1  ;;  %s1953_s25 = sld [smem:[#allocation9 + $0x34]] }
 0x188   : > { %v3101_v39 = vpop.permute.xlu1 %510  ;;  %1532 = vrot.lane.b32.xlu0 %v1530_v28, %s3539_s8  ;;  %v566_v28 = vsel %vm344_vm9, %v2910_v60, %v565_v61  ;;  %v411_v30 = vrot.slane %v2979_v48, 2  ;;  %v393_v29 = vrot.slane %v2934_v13, 1  ;;  %v394_v34 = vrot.slane %v2934_v13, 2  ;;  %s3556_s8 = smov 77  }
 0x189   : > { %v1098_v42 = vstv %s3111_s19  ;;  %v468_v43 = vsel %vm355_vm11, %v2884_v38, %v467_v14  ;;  %vm3555_vm5 = vcmask 654336   ;;  %v666_v45 = vrot.slane %v2942_v18, 1  ;;  %s3339_s19 = sld [smem:[#allocation9 + $0x35]] }
 0x18a   : > { %1628 = vrot.lane.b32.xlu1 %v1626_v59, %s3545_s10  ;;  %v493_v35 = vpop.permute.xlu0 %492  ;;  %v361_v59 = vmul.f32 %v3010_v9, %v360_v16  ;;  %v478_v60 = vsel %vm3555_vm5, %v2927_v31, %v477_v37  ;;  %v585_v48 = vrot.slane %v2951_v23, 1  ;;  %v568_v47 = vadd.f32 %v566_v28, %v557_v12  ;;  %s3171_s10 = sld [smem:[#allocation9 + $0x46]]  ;;  %vm3557_vm10 = vmmov %vm3555_vm5 }
 0x18b   : > { %v494_v32 = vrot.slane %v493_v35, 7  ;;  %v576_v13 = vsel %vm355_vm11, %v2916_v0, %v575_v22  ;;  %v470_v33 = vadd.f32 %v468_v43, %v460_v40  ;;  %v676_v56 = vrot.slane %v2962_v27, 1 }
 0x18c   : > { %v3119_v1 = vpop.permute.xlu1 %618  ;;  %1692 = vrot.lane.b32.xlu0 %v1690_v53, %s3550_s4  ;;  %v380_v53 = vmul.f32 %v378_v20, %v371_v58  ;;  %v413_v38 = vsel %vm412_vm4, %v410_v25, %v411_v30  ;;  %v396_v12 = vsel %vm395_vm3, %v393_v29, %v394_v34  ;;  %v688_v0 = vrot.slane %v2990_v54, 7 }
 0x18d   : > { %v496_v31 = vsel %vm495_vm0, %v494_v32, %v493_v35  ;;  %v480_v62 = vadd.f32 %v478_v60, %v470_v33  ;;  %v512_v63 = vrot.slane %v3101_v39, 7  ;;  %v667_v58 = vsel %vm344_vm9, %v2942_v18, %v666_v45 }
 0x18e   : > { %1724 = vrot.lane.b32.xlu1 %v1722_v55, %s3550_s4  ;;  %v601_v51 = vpop.permute.xlu0 %600  ;;  %v586_v35 = vsel %vm3557_vm10, %v2951_v23, %v585_v48  ;;  %v1099_v61 = vmul.f32 %v3001_v2, %v1098_v42  ;;  %v578_v7 = vadd.f32 %v576_v13, %v568_v47  ;;  %v415_v14 = vmul.f32 %v413_v38, %v407_v46  ;;  %vm3559_vm10 = vmmov %vm3555_vm5 }
 0x18f   : > { %v602_v57 = vrot.slane %v601_v51, 7  ;;  %v1108_v37 = vstv %s3142_s6  ;;  %v677_v16 = vsel %vm355_vm11, %v2962_v27, %v676_v56  ;;  %vm3558_vm2 = vcmask 646144   ;;  %vm3561_vm14 = vmmov %vm3559_vm10  ;;  %s3342_s6 = sld [smem:[#allocation9 + $0x36]] }
 0x190   : > { %v3138_v5 = vpop.permute.xlu1 %789  ;;  %1708 = vrot.lane.b32.xlu0 %v1706_v4, %s3550_s4  ;;  %v498_v4 = vadd.f32 %v496_v31, %v480_v62  ;;  %v398_v20 = vmul.f32 %v396_v12, %v390_v11  ;;  %v669_v23 = vadd.f32 %v667_v58, %v3126_v15  ;;  %v588_v22 = vadd.f32 %v586_v35, %v578_v7  ;;  %s2310_s4 = smov 123  }
 0x191   : > { %v604_v40 = vsel %vm3558_vm2, %v602_v57, %v601_v51  ;;  %v513_v28 = vsel %vm495_vm0, %v512_v63, %v3101_v39  ;;  %v620_v46 = vrot.slane %v3119_v1, 7  ;;  %v543_v34 = vrot.slane %v3039_v52, 7 }
 0x192   : > { %v528_v36 = vpop.permute.xlu0 %527  ;;  %352 = vrot.lane.b32.xlu1 %v350_v10, %s3554_s0  ;;  %v679_v30 = vadd.f32 %v677_v16, %v669_v23  ;;  %v606_v32 = vadd.f32 %v604_v40, %v588_v22  ;;  %v515_v15 = vadd.f32 %v513_v28, %v498_v4  ;;  %v765_v42 = vrot.slane %v2968_v41, 1 }
 0x193   : > { %v529_v3 = vrot.slane %v528_v36, 7  ;;  %v1118_v45 = vstv %s3171_s10  ;;  %v621_v48 = vsel %vm3558_vm2, %v620_v46, %v3119_v1  ;;  %v775_v57 = vrot.slane %v2999_v44, 1  ;;  %s1883_s10 = sshll.u32 %s2500_s24, 1 }
 0x194   : > { %v636_v24 = vpop.permute.xlu1 %635  ;;  %341 = vrot.lane.b32.xlu0 %v339_v21, %s3544_s28  ;;  %v689_v21 = vsel %vm3555_vm5, %v688_v0, %v2990_v54  ;;  %v756_v54 = vstv %s3163_s1  ;;  %vm3560_vm5 = vmmov %vm3558_vm2  ;;  %v3215_v62 = vsel %vm495_vm0, %v543_v34, %v3039_v52  ;;  %v644_v1 = vrot.slane %v3064_v8, 7  ;;  %s1932_s1 = sld [smem:[#allocation9 + $0x31]] }
 0x195   : > { %v530_v27 = vsel %vm495_vm0, %v529_v3, %v528_v36  ;;  %v637_v51 = vrot.slane %v636_v24, 7  ;;  %v691_v43 = vadd.f32 %v689_v21, %v679_v30  ;;  %v757_v31 = vmul.f32 %v3010_v9, %v756_v54 }
 0x196   : > { %v703_v55 = vpop.permute.xlu0 %702  ;;  %382 = vrot.lane.b32.xlu1 %v380_v53, %s3556_s8  ;;  %v532_v36 = vadd.f32 %v530_v27, %v515_v15  ;;  %v623_v53 = vadd.f32 %v621_v48, %v606_v32  ;;  %v791_v58 = vrot.slane %v3138_v5, 7  ;;  %v776_v3 = vsel %vm355_vm11, %v2999_v44, %v775_v57 }
 0x197   : > { %v704_v18 = vrot.slane %v703_v55, 7  ;;  %v638_v47 = vsel %vm3560_vm5, %v637_v51, %v636_v24  ;;  %v743_v7 = vrot.slane %v3087_v50, 7  ;;  %v1128_v30 = vstv %s1936_s27  ;;  %s229_s27 = scalar_lea.vmem [#allocation12], %s1883_s10 }
 0x198   : > { %v3178_v10 = vpop.permute.xlu1 %806  ;;  %363 = vrot.lane.b32.xlu0 %v361_v59, %s3542_s11  ;;  %v1109_v59 = vmul.f32 %v3001_v2, %v1108_v37  ;;  %v546_v24 = vmul.f32 %v3215_v62, %v532_v36  ;;  %v640_v12 = vadd.f32 %v638_v47, %v623_v53  ;;  %v792_v40 = vsel %vm630_vm8, %v791_v58, %v3138_v5 }
 0x199   : > { %v705_v39 = vsel %vm3559_vm10, %v704_v18, %v703_v55  ;;  %v1119_v55 = vmul.f32 %v3001_v2, %v1118_v45  ;;  %v808_v4 = vrot.slane %v3178_v10, 7 }
 0x19a   : > { %v719_v25 = vpop.permute.xlu0 %718  ;;  %417 = vrot.lane.b32.xlu1 %v415_v14, %s3556_s8  ;;  %v707_v56 = vadd.f32 %v705_v39, %v691_v43 }
 0x19b   : > { %v720_v11 = vrot.slane %v719_v25, 7  ;;  %v809_v23 = vsel %vm630_vm8, %v808_v4, %v3178_v10 }
 0x19c   : > { %v735_v29 = vpop.permute.xlu1 %734  ;;  %400 = vrot.lane.b32.xlu0 %v398_v20, %s3556_s8 }
 0x19d   : > { %v721_v13 = vsel %vm3561_vm14, %v720_v11, %v719_v25  ;;  %v736_v33 = vrot.slane %v735_v29, 7  ;;  %vm3562_vm14 = vmmov %vm3559_vm10 }
 0x19e   : > { %v3199_v60 = vpop.permute.xlu0 %908  ;;  %1101 = vrot.lane.b32.xlu1 %v1099_v61, %s3544_s28  ;;  %v723_v0 = vadd.f32 %v721_v13, %v707_v56  ;;  %s3563_s28 = smov 127   ;;  %vm3564_vm10 = vmmov %vm3558_vm2 }
 0x19f   : > { %v737_v35 = vsel %vm3562_vm14, %v736_v33, %v735_v29  ;;  %v3230_v61 = vsel %vm3564_vm10, %v644_v1, %v3064_v8  ;;  %vm3565_vm2 = vmmov %vm3562_vm14  ;;  %v910_v45 = vrot.slane %v3199_v60, 7 }
 0x1a0   : > { %v3207_v38 = vpop.permute.xlu1 %925  ;;  %440 = vrot.lane.b32.xlu0 %v2654_v26, %s3556_s8  ;;  %v766_v26 = vsel %vm344_vm9, %v2968_v41, %v765_v42  ;;  %v647_v41 = vmul.f32 %v3230_v61, %v640_v12  ;;  %v739_v37 = vadd.f32 %v737_v35, %v723_v0  ;;  %v3245_v20 = vsel %vm3565_vm2, %v743_v7, %v3087_v50  ;;  %vm3571_vm10 = vmmov %vm3565_vm2 }
 0x1a1   : > { %v768_v14 = vadd.f32 %v766_v26, %v757_v31  ;;  %v911_v13 = vsel %vm522_vm7, %v910_v45, %v3199_v60  ;;  %v927_v33 = vrot.slane %v3207_v38, 7  ;;  %v1145_v31 = vstv %s1937_s5 }
 0x1a2   : > { %v824_v63 = vpop.permute.xlu0 %823  ;;  %1111 = vrot.lane.b32.xlu1 %v1109_v59, %s3554_s0  ;;  %v746_v21 = vmul.f32 %v3245_v20, %v739_v37  ;;  %s3363_s0 = sld [smem:[#allocation9 + $0x37]] }
 0x1a3   : > { %v825_v44 = vrot.slane %v824_v63, 7  ;;  %v778_v18 = vadd.f32 %v776_v3, %v768_v14  ;;  %v928_v0 = vsel %vm522_vm7, %v927_v33, %v3207_v38 }
 0x1a4   : > { %v840_v52 = vpop.permute.xlu1 %839  ;;  %548 = vrot.lane.b32.xlu0 %v546_v24, %s3563_s28  ;;  %v913_v24 = vadd.f32 %v911_v13, %v3036_v49 }
 0x1a5   : > { %v794_v22 = vadd.f32 %v792_v40, %v778_v18  ;;  %v826_v5 = vsel %vm630_vm8, %v825_v44, %v824_v63  ;;  %v841_v25 = vrot.slane %v840_v52, 7 }
 0x1a6   : > { %v3235_v16 = vpop.permute.xlu0 %1020  ;;  %1121 = vrot.lane.b32.xlu1 %v1119_v55, %s3542_s11  ;;  %s3566_s11 = smov 125  }
 0x1a7   : > { %v811_v46 = vadd.f32 %v809_v23, %v794_v22  ;;  %v842_v50 = vsel %vm630_vm8, %v841_v25, %v840_v52  ;;  %v1022_v60 = vrot.slane %v3235_v16, 7  ;;  %v930_v52 = vadd.f32 %v928_v0, %v913_v24 }
 0x1a8   : > { %v3240_v8 = vpop.permute.xlu1 %1037  ;;  %649 = vrot.lane.b32.xlu0 %v647_v41, %s3540_s22 }
 0x1a9   : > { %v828_v51 = vadd.f32 %v826_v5, %v811_v46  ;;  %v1023_v4 = vsel %vm412_vm4, %v1022_v60, %v3235_v16  ;;  %v1039_v14 = vrot.slane %v3240_v8, 7 }
 0x1aa   : > { %v943_v28 = vpop.permute.xlu0 %942  ;;  %v1025_v23 = vadd.f32 %v1023_v4, %v3075_v17 }
 0x1ab   : > { %v844_v34 = vadd.f32 %v842_v50, %v828_v51  ;;  %v944_v56 = vrot.slane %v943_v28, 7  ;;  %v1040_v5 = vsel %vm412_vm4, %v1039_v14, %v3240_v8 }
 0x1ac   : > { %v3251_v27 = vpop.permute.xlu1 %1196  ;;  %748 = vrot.lane.b32.xlu0 %v746_v21, %s3566_s11  ;;  %v1161_v21 = vstv %s3278_s29  ;;  %v1042_v50 = vadd.f32 %v1040_v5, %v1025_v23 }
 0x1ad   : > { %v945_v35 = vsel %vm522_vm7, %v944_v56, %v943_v28 }
 0x1ae   : > { %v1131_v11 = vpop.permute.xlu0 %1130  ;;  %v947_v38 = vadd.f32 %v945_v35, %v930_v52  ;;  %v1269_v52 = vstv %s1946_s9 }
 0x1af   : > { %v1132_v32 = vrot.slane %v1131_v11, 1  ;;  %v1133_v15 = vrot.slane %v1131_v11, 2 }
 0x1b0   : > { %v861_v10 = vpop.permute.xlu1 %860 }
 0x1b1   : > { %v1134_v29 = vsel %vm377_vm15, %v1132_v32, %v1133_v15  ;;  %v862_v54 = vrot.slane %v861_v10, 7  ;;  %v1179_v15 = vstv %s3284_s21  ;;  %vm3567_vm15 = vmmov %vm3565_vm2 }
 0x1b2   : > { %v1136_v39 = vmul.f32 %v1134_v29, %v1128_v30  ;;  %v3256_v59 = vpop.permute.xlu0 %1276 }
 0x1b3   : > { %v3259_v42 = vsel %vm630_vm8, %v862_v54, %v861_v10  ;;  %v1188_v10 = vrot.slane %v3077_v19, 1 }
 0x1b4   : > { %v865_v43 = vmul.f32 %v3259_v42, %v844_v34  ;;  %v1055_v36 = vpop.permute.xlu1 %1054  ;;  %1138 = vrot.lane.b32.xlu1 %v1136_v39, %s3556_s8  ;;  %v1198_v34 = vrot.slane %v3251_v27, 1 }
 0x1b5   : > { %v1056_v44 = vrot.slane %v1055_v36, 7 }
 0x1b6   : > { %v959_v48 = vpop.permute.xlu0 %958  ;;  %867 = vrot.lane.b32.xlu0 %v865_v43, %s2309_s18  ;;  %v1180_v43 = vmul.f32 %v3001_v2, %v1179_v15 }
 0x1b7   : > { %v960_v63 = vrot.slane %v959_v48, 7  ;;  %v1057_v11 = vsel %vm412_vm4, %v1056_v44, %v1055_v36 }
 0x1b8   : > { %v3265_v47 = vpop.permute.xlu1 %1206  ;;  %v1059_v29 = vadd.f32 %v1057_v11, %v1042_v50 }
 0x1b9   : > { %v961_v3 = vsel %vm522_vm7, %v960_v63, %v959_v48  ;;  %v1189_v48 = vsel %vm344_vm9, %v3077_v19, %v1188_v10  ;;  %v1208_v13 = vrot.slane %v3265_v47, 1 }
 0x1ba   : > { %v1147_v53 = vpop.permute.xlu0 %1146  ;;  %v963_v37 = vadd.f32 %v961_v3, %v947_v38 }
 0x1bb   : > { %v1148_v57 = vrot.slane %v1147_v53, 1  ;;  %v1149_v1 = vrot.slane %v1147_v53, 2  ;;  %v1209_v19 = vsel %vm3567_vm15, %v3265_v47, %v1208_v13  ;;  %v1270_v47 = vmul.f32 %v3001_v2, %v1269_v52  ;;  %vm3572_vm15 = vmmov %vm3565_vm2 }
 0x1bc   : > { %v3271_v12 = vpop.permute.xlu1 %1366  ;;  %v1547_v52 = vstv %s3342_s6 }
 0x1bd   : > { %v1150_v55 = vsel %vm395_vm3, %v1148_v57, %v1149_v1  ;;  %v1191_v1 = vadd.f32 %v1189_v48, %v1180_v43  ;;  %vm3568_vm3 = vmmov %vm3565_vm2 }
 0x1be   : > { %v1152_v26 = vmul.f32 %v1150_v55, %v1145_v31  ;;  %v3276_v58 = vpop.permute.xlu0 %1286  ;;  %v1199_v31 = vsel %vm355_vm11, %v3251_v27, %v1198_v34  ;;  %v1278_v27 = vrot.slane %v3256_v59, 1 }
 0x1bf   : > { %v1201_v63 = vadd.f32 %v1199_v31, %v1191_v1 }
 0x1c0   : > { %v1071_v49 = vpop.permute.xlu1 %1070  ;;  %1154 = vrot.lane.b32.xlu1 %v1152_v26, %s3556_s8 }
 0x1c1   : > { %v1072_v16 = vrot.slane %v1071_v49, 7  ;;  %v1211_v60 = vadd.f32 %v1209_v19, %v1201_v63 }
 0x1c2   : > { %v973_v7 = vpop.permute.xlu0 %972 }
 0x1c3   : > { %v974_v41 = vrot.slane %v973_v7, 7  ;;  %v1073_v8 = vsel %vm412_vm4, %v1072_v16, %v1071_v49 }
 0x1c4   : > { %v1223_v40 = vpop.permute.xlu1 %1222  ;;  %v1075_v36 = vadd.f32 %v1073_v8, %v1059_v29  ;;  %v1359_v29 = vstv %s1953_s25 }
 0x1c5   : > { %v3290_v18 = vsel %vm522_vm7, %v974_v41, %v973_v7  ;;  %v1224_v57 = vrot.slane %v1223_v40, 7  ;;  %v1288_v7 = vrot.slane %v3276_v58, 1 }
 0x1c6   : > { %v977_v22 = vmul.f32 %v3290_v18, %v963_v37  ;;  %v1163_v28 = vpop.permute.xlu0 %1162  ;;  %v1279_v37 = vsel %vm344_vm9, %v3256_v59, %v1278_v27 }
 0x1c7   : > { %v1164_v25 = vrot.slane %v1163_v28, 1  ;;  %v1165_v46 = vrot.slane %v1163_v28, 2  ;;  %v1225_v26 = vsel %vm495_vm0, %v1224_v57, %v1223_v40  ;;  %v1281_v5 = vadd.f32 %v1279_v37, %v1270_v47 }
 0x1c8   : > { %v3297_v51 = vpop.permute.xlu1 %1376  ;;  %979 = vrot.lane.b32.xlu0 %v977_v22, %s2310_s4  ;;  %v1227_v3 = vadd.f32 %v1225_v26, %v1211_v60 }
 0x1c9   : > { %v1166_v17 = vsel %vm412_vm4, %v1164_v25, %v1165_v46 }
 0x1ca   : > { %v1168_v30 = vmul.f32 %v1166_v17, %v1161_v21  ;;  %v1297_v32 = vpop.permute.xlu0 %1296  ;;  %v1289_v21 = vsel %vm355_vm11, %v3276_v58, %v1288_v7 }
 0x1cb   : > { %v1298_v40 = vrot.slane %v1297_v32, 1  ;;  %v1291_v17 = vadd.f32 %v1289_v21, %v1281_v5 }
 0x1cc   : > { %v1078_v54 = vpop.permute.xlu1 %1077  ;;  %1170 = vrot.lane.b32.xlu1 %v1168_v30, %s3556_s8  ;;  %s2312_s8 = smov 51  }
 0x1cd   : > { %v1079_v39 = vrot.slane %v1078_v54, 7  ;;  %v1299_v46 = vsel %vm3568_vm3, %v1297_v32, %v1298_v40  ;;  %vm3573_vm3 = vmmov %vm3565_vm2 }
 0x1ce   : > { %v3308_v45 = vpop.permute.xlu0 %1458  ;;  %v1301_v30 = vadd.f32 %v1299_v46, %v1291_v17 }
 0x1cf   : > { %v3314_v33 = vsel %vm412_vm4, %v1079_v39, %v1078_v54  ;;  %v1378_v39 = vrot.slane %v3297_v51, 1  ;;  %v1460_v63 = vrot.slane %v3308_v45, 1 }
 0x1d0   : > { %v1082_v53 = vmul.f32 %v3314_v33, %v1075_v36  ;;  %v1313_v56 = vpop.permute.xlu1 %1312  ;;  %v1360_v36 = vmul.f32 %v3001_v2, %v1359_v29 }
 0x1d1   : > { %v1314_v28 = vrot.slane %v1313_v56, 7  ;;  %v1379_v1 = vsel %vm355_vm11, %v3297_v51, %v1378_v39 }
 0x1d2   : > { %v1239_v24 = vpop.permute.xlu0 %1238  ;;  %1084 = vrot.lane.b32.xlu0 %v1082_v53, %s2311_s20 }
 0x1d3   : > { %v1240_v0 = vrot.slane %v1239_v24, 7  ;;  %v1315_v59 = vsel %vm3560_vm5, %v1314_v28, %v1313_v56 }
 0x1d4   : > { %v3322_v55 = vpop.permute.xlu1 %1468  ;;  %v1317_v58 = vadd.f32 %v1315_v59, %v1301_v30 }
 0x1d5   : > { %v1241_v49 = vsel %vm495_vm0, %v1240_v0, %v1239_v24  ;;  %v1451_v0 = vstv %s3339_s19 }
 0x1d6   : > { %v1389_v35 = vpop.permute.xlu0 %1388  ;;  %v1243_v14 = vadd.f32 %v1241_v49, %v1227_v3  ;;  %v1470_v3 = vrot.slane %v3322_v55, 1  ;;  %v1452_v7 = vmul.f32 %v3001_v2, %v1451_v0 }
 0x1d7   : > { %v1390_v56 = vrot.slane %v1389_v35, 7 }
 0x1d8   : > { %v1255_v38 = vpop.permute.xlu1 %1254  ;;  %v1471_v28 = vsel %vm355_vm11, %v3322_v55, %v1470_v3 }
 0x1d9   : > { %v1256_v4 = vrot.slane %v1255_v38, 7  ;;  %v1391_v60 = vsel %vm3571_vm10, %v1390_v56, %v1389_v35  ;;  %v1548_v35 = vmul.f32 %v3001_v2, %v1547_v52 }
 0x1da   : > { %v1555_v41 = vpop.permute.xlu0 %1554 }
 0x1db   : > { %v1257_v44 = vsel %vm495_vm0, %v1256_v4, %v1255_v38  ;;  %vm3569_vm0 = vmmov %vm3560_vm5  ;;  %v1461_v4 = vsel %vm344_vm9, %v3308_v45, %v1460_v63  ;;  %vm1087_vm5 = vcmask 998400  }
 0x1dc   : > { %v1259_v23 = vadd.f32 %v1257_v44, %v1243_v14  ;;  %v1405_v22 = vpop.permute.xlu1 %1404  ;;  %vm3570_vm14 = vmmov %vm3569_vm0 }
 0x1dd   : > { %v1406_v24 = vrot.slane %v1405_v22, 7 }
 0x1de   : > { %v1260_v16 = vmul.f32 %v1259_v23, %v3215_v62  ;;  %v1329_v25 = vpop.permute.xlu0 %1328  ;;  %v1368_v62 = vrot.slane %v3271_v12, 1 }
 0x1df   : > { %v1330_v11 = vrot.slane %v1329_v25, 7  ;;  %v1407_v51 = vsel %vm3565_vm2, %v1406_v24, %v1405_v22 }
 0x1e0   : > { %v1565_v50 = vpop.permute.xlu1 %1564  ;;  %1262 = vrot.lane.b32.xlu1 %v1260_v16, %s3563_s28  ;;  %v1369_v53 = vsel %vm344_vm9, %v3271_v12, %v1368_v62  ;;  %v1556_v12 = vrot.slane %v1555_v41, 1  ;;  %v1643_v62 = vstv %s3363_s0  ;;  %s1988_s28 = sshll.u32 %s2269_s15, 5  ;;  %s1753_s15 = scalar_lea.sflag [#allocation7], %s2500_s24 }
 0x1e1   : > { %v1331_v10 = vsel %vm3569_vm0, %v1330_v11, %v1329_v25  ;;  %v1371_v19 = vadd.f32 %v1369_v53, %v1360_v36  ;;  %v1566_v38 = vrot.slane %v1565_v50, 1  ;;  %v1463_v25 = vadd.f32 %v1461_v4, %v1452_v7  ;;  %s3434_s29 = scalar_lea.hbm %s3488_s3, %s1988_s28 }
 0x1e2   : > { %v1485_v15 = vpop.permute.xlu0 %1484  ;;  %v1333_v54 = vadd.f32 %v1331_v10, %v1317_v58  ;;  %v1557_v37 = vsel %vm344_vm9, %v1555_v41, %v1556_v12 }
 0x1e3   : > { %v1381_v49 = vadd.f32 %v1379_v1, %v1371_v19  ;;  %v1486_v40 = vrot.slane %v1485_v15, 7  ;;  %v1567_v5 = vsel %vm355_vm11, %v1565_v50, %v1566_v38  ;;  %v1559_v46 = vadd.f32 %v1557_v37, %v1548_v35 }
 0x1e4   : > { %v1345_v8 = vpop.permute.xlu1 %1344  ;;  %v1473_v58 = vadd.f32 %v1471_v28, %v1463_v25 }
 0x1e5   : > { %v1346_v32 = vrot.slane %v1345_v8, 7  ;;  %v1393_v47 = vadd.f32 %v1391_v60, %v1381_v49  ;;  %v1487_v41 = vsel %vm630_vm8, %v1486_v40, %v1485_v15 }
 0x1e6   : > { %v3344_v34 = vpop.permute.xlu0 %1650  ;;  %v1489_v39 = vadd.f32 %v1487_v41, %v1473_v58 }
 0x1e7   : > { %v1347_v43 = vsel %vm3570_vm14, %v1346_v32, %v1345_v8  ;;  %v1409_v21 = vadd.f32 %v1407_v51, %v1393_v47  ;;  %v1569_v8 = vadd.f32 %v1567_v5, %v1559_v46  ;;  %v1652_v50 = vrot.slane %v3344_v34, 1 }
 0x1e8   : > { %v1349_v48 = vadd.f32 %v1347_v43, %v1333_v54  ;;  %v1501_v13 = vpop.permute.xlu1 %1500 }
 0x1e9   : > { %v1502_v16 = vrot.slane %v1501_v13, 7 }
 0x1ea   : > { %v1350_v31 = vmul.f32 %v1349_v48, %v3230_v61  ;;  %v1421_v57 = vpop.permute.xlu0 %1420 }
 0x1eb   : > { %v1422_v27 = vrot.slane %v1421_v57, 7  ;;  %v1503_v32 = vsel %vm630_vm8, %v1502_v16, %v1501_v13  ;;  %v1653_v13 = vsel %vm344_vm9, %v3344_v34, %v1652_v50 }
 0x1ec   : > { %v3356_v26 = vpop.permute.xlu1 %1660  ;;  %1352 = vrot.lane.b32.xlu0 %v1350_v31, %s3540_s22  ;;  %v1505_v1 = vadd.f32 %v1503_v32, %v1489_v39  ;;  %s333_s22 = sld [smem:[#allocation9]] }
 0x1ed   : > { %v1423_v44 = vsel %vm3572_vm15, %v1422_v27, %v1421_v57  ;;  %v1662_v48 = vrot.slane %v3356_v26, 1  ;;  %v1644_v57 = vmul.f32 %v3001_v2, %v1643_v62 }
 0x1ee   : > { %v1581_v61 = vpop.permute.xlu0 %1580  ;;  %v1425_v11 = vadd.f32 %v1423_v44, %v1409_v21 }
 0x1ef   : > { %v1582_v23 = vrot.slane %v1581_v61, 7  ;;  %v1663_v12 = vsel %vm355_vm11, %v3356_v26, %v1662_v48  ;;  %v1655_v49 = vadd.f32 %v1653_v13, %v1644_v57 }
 0x1f0   : > { %v1517_v14 = vpop.permute.xlu1 %1516 }
 0x1f1   : > { %v1583_v59 = vsel %vm522_vm7, %v1582_v23, %v1581_v61  ;;  %v1518_v30 = vrot.slane %v1517_v14, 7  ;;  %v1665_v4 = vadd.f32 %v1663_v12, %v1655_v49 }
 0x1f2   : > { %v1437_v22 = vpop.permute.xlu0 %1436  ;;  %v1585_v43 = vadd.f32 %v1583_v59, %v1569_v8  ;;  %v334_v41 = vstv %s333_s22 }
 0x1f3   : > { %v1438_v45 = vrot.slane %v1437_v22, 7  ;;  %v1519_v53 = vsel %vm630_vm8, %v1518_v30, %v1517_v14 }
 0x1f4   : > { %v1677_v17 = vpop.permute.xlu1 %1676  ;;  %v1521_v60 = vadd.f32 %v1519_v53, %v1505_v1 }
 0x1f5   : > { %v1439_v10 = vsel %vm3573_vm3, %v1438_v45, %v1437_v22  ;;  %v1678_v0 = vrot.slane %v1677_v17, 7 }
 0x1f6   : > { %v1441_v29 = vadd.f32 %v1439_v10, %v1425_v11  ;;  %v1597_v55 = vpop.permute.xlu0 %1596  ;;  %v335_v10 = vmul.f32 %v3010_v9, %v334_v41 }
 0x1f7   : > { %v1598_v54 = vrot.slane %v1597_v55, 7  ;;  %v1679_v38 = vsel %vm412_vm4, %v1678_v0, %v1677_v17 }
 0x1f8   : > { %v1442_v36 = vmul.f32 %v1441_v29, %v3245_v20  ;;  %v1613_v15 = vpop.permute.xlu1 %1612  ;;  %v1681_v26 = vadd.f32 %v1679_v38, %v1665_v4 }
 0x1f9   : > { %v1599_v56 = vsel %vm522_vm7, %v1598_v54, %v1597_v55  ;;  %v1614_v31 = vrot.slane %v1613_v15, 7 }
 0x1fa   : > { %v1601_v24 = vadd.f32 %v1599_v56, %v1585_v43  ;;  %v1533_v19 = vpop.permute.xlu0 %1532  ;;  %1444 = vrot.lane.b32.xlu1 %v1442_v36, %s3566_s11  ;;  %s1767_s11 = sshll.u32 %s229_s27, 4  ;;  %s3436_s11 = int_to_ptr.vmem [resolvable:$true] %s1767_s11 }
 0x1fb   : > { %v1615_v20 = vsel %vm522_vm7, %v1614_v31, %v1613_v15  ;;  %v1534_v63 = vrot.slane %v1533_v19, 7  ;;  %v1094_v31 = vstv %s1932_s1  ;;  %s2187_s21 = scalar_lea.vmem %s3436_s11, 32 }
 0x1fc   : > { %v1629_v52 = vpop.permute.xlu1 %1628  ;;  %v1617_v61 = vadd.f32 %v1615_v20, %v1601_v24  ;;  %p2188_p8 = scmp.ne.s32.totalorder %s3436_s11, %s2187_s21 }
 0x1fd   : > { %v1535_v27 = vsel %vm630_vm8, %v1534_v63, %v1533_v19  ;;  %v1630_v2 = vrot.slane %v1629_v52, 7  ;;  %v2113_v19 = vld [vmem:[#allocation4 + $0x1] ss:$2 sm:$0xf]  ;;  %vm3575_vm8 = vmmov %vm3565_vm2 }
 0x1fe   : > { %v1537_v3 = vadd.f32 %v1535_v27, %v1521_v60  ;;  %v1693_v51 = vpop.permute.xlu0 %1692  ;;  %v1095_v13 = vmul.f32 %v2113_v19, %v1094_v31  ;;  %p2189_p10 = pnand %p2188_p8, %p3578_p2 }
 0x1ff   : > { %v1631_v34 = vsel %vm522_vm7, %v1630_v2, %v1629_v52  ;;  %v1694_v7 = vrot.slane %v1693_v51, 7  ;;  %vm3574_vm7 = vmmov %vm3565_vm2 }
 0x200   : > { %v1538_v47 = vmul.f32 %v1537_v3, %v3259_v42  ;;  %v1633_v35 = vadd.f32 %v1631_v34, %v1617_v61  ;;  %v1725_v14 = vpop.permute.xlu1 %1724  ;;  %p2190_p13 = pneg %p2189_p10 }
 0x201   : > { %v1695_v37 = vsel %vm412_vm4, %v1694_v7, %v1693_v51  ;;  %v1726_v23 = vrot.slane %v1725_v14, 7 }
 0x202   : > { %v1634_v40 = vmul.f32 %v1633_v35, %v3290_v18  ;;  %v1709_v44 = vpop.permute.xlu0 %1708  ;;  %1540 = vrot.lane.b32.xlu0 %v1538_v47, %s2309_s18  ;;  %v1697_v22 = vadd.f32 %v1695_v37, %v1681_v26 }
 0x203   : > { %v1710_v21 = vrot.slane %v1709_v44, 7  ;;  %v1727_v42 = vsel %vm412_vm4, %v1726_v23, %v1725_v14 }
 0x204   : > { %1636 = vrot.lane.b32.xlu1 %v1634_v40, %s2310_s4  ;;  %v353_v18 = vpop.permute.xlu1 %352  ;;  %s2313_s4 = smov [#allocation12]  }
 0x205   : > { %v1711_v28 = vsel %vm412_vm4, %v1710_v21, %v1709_v44  ;;  %v354_v8 = vrot.slane %v353_v18, 1  ;;  %vm982_vm4 = vcmask 1006592   ;;  %s2191_s9 = sshll.u32 %s2313_s4, 4  ;;  %s2192_s9 = int_to_ptr.vmem [resolvable:$false] %s2191_s9 }
 0x206   : > { %v1713_v5 = vadd.f32 %v1711_v28, %v1697_v22  ;;  %v342_v25 = vpop.permute.xlu0 %341  ;;  %p2194_p0 = scmp.lt.s32.totalorder %s3436_s11, %s2192_s9 }
 0x207   : > { %v343_v59 = vrot.slane %v342_v25, 1 }
 0x208   : > { %v1729_v16 = vadd.f32 %v1727_v42, %v1713_v5  ;;  %v383_v11 = vpop.permute.xlu1 %382 }
 0x209   : > { %v345_v29 = vsel %vm344_vm9, %v342_v25, %v343_v59  ;;  %v384_v36 = vrot.slane %v383_v11, 7 }
 0x20a   : > { %v1730_v45 = vmul.f32 %v1729_v16, %v3314_v33  ;;  %v364_v46 = vpop.permute.xlu0 %363  ;;  %v347_v62 = vadd.f32 %v345_v29, %v335_v10  ;;  %v356_v33 = vsel %vm355_vm11, %v353_v18, %v354_v8 }
 0x20b   : > { %v365_v50 = vrot.slane %v364_v46, 1  ;;  %v386_v56 = vsel %vm385_vm12, %v384_v36, %v383_v11 }
 0x20c   : > { %1732 = vrot.lane.b32.xlu0 %v1730_v45, %s2311_s20  ;;  %v418_v30 = vpop.permute.xlu1 %417  ;;  %v358_v54 = vadd.f32 %v356_v33, %v347_v62  ;;  %s2193_s20 = scalar_lea.vmem %s2192_s9, 64 }
 0x20d   : > { %v367_v43 = vsel %vm3574_vm7, %v364_v46, %v365_v50  ;;  %v419_v20 = vrot.slane %v418_v30, 7  ;;  %p2195_p6 = scmp.lt.s32.totalorder %s2193_s20, %s2187_s21 }
 0x20e   : > { %v401_v17 = vpop.permute.xlu0 %400  ;;  %v369_v15 = vadd.f32 %v367_v43, %v358_v54 }
 0x20f   : > { %v402_v53 = vrot.slane %v401_v17, 7  ;;  %v420_v61 = vsel %vm385_vm12, %v419_v20, %v418_v30  ;;  %p2196_p3 = por %p2195_p6, %p2194_p0 }
 0x210   : > { %v1102_v55 = vpop.permute.xlu1 %1101  ;;  %v388_v1 = vadd.f32 %v386_v56, %v369_v15 }
 0x211   : > { %v1103_v57 = vrot.slane %v1102_v55, 1  ;;  %v403_v24 = vsel %vm385_vm12, %v402_v53, %v401_v17  ;;  %p2197_p11 = pnand %p2196_p3, %p2190_p13 }
 0x212   : > { %v441_v58 = vpop.permute.xlu0 %440  ;;  %v405_v52 = vadd.f32 %v403_v24, %v388_v1 }
 0x213   : > { %v1104_v63 = vsel %vm344_vm9, %v1102_v55, %v1103_v57  ;;  %v442_v27 = vrot.slane %v441_v58, 7  ;;  %vm870_vm9 = vcmask 1014784  }
 0x214   : > { %v1112_v39 = vpop.permute.xlu1 %1111  ;;  %v1106_v2 = vadd.f32 %v1104_v63, %v1095_v13  ;;  %v422_v34 = vadd.f32 %v420_v61, %v405_v52 }
 0x215   : > { %v1113_v60 = vrot.slane %v1112_v39, 1  ;;  %v443_v4 = vsel %vm385_vm12, %v442_v27, %v441_v58 }
 0x216   : > { %v549_v32 = vpop.permute.xlu0 %548  ;;  %v445_v23 = vmul.f32 %v443_v4, %v422_v34 }
 0x217   : > { %v550_v3 = vrot.slane %v549_v32, 1  ;;  %v1114_v51 = vsel %vm355_vm11, %v1112_v39, %v1113_v60  ;;  %vm3576_vm11 = vcmask 1022976  }
 0x218   : > { %v1122_v9 = vpop.permute.xlu1 %1121  ;;  %v1116_v35 = vadd.f32 %v1114_v51, %v1106_v2 }
 0x219   : > { %v1123_v38 = vrot.slane %v1122_v9, 1  ;;  %v552_v37 = vsel %vm551_vm6, %v549_v32, %v550_v3 }
 0x21a   : > { %v650_v48 = vpop.permute.xlu0 %649  ;;  %v554_v42 = vadd.f32 %v552_v37, %v445_v23 }
 0x21b   : > { %v651_v47 = vrot.slane %v650_v48, 1  ;;  %v1124_v40 = vsel %vm3575_vm8, %v1122_v9, %v1123_v38 }
 0x21c   : > { %v1126_v16 = vadd.f32 %v1124_v40, %v1116_v35 }
 0x21d   : > { %v653_v22 = vsel %vm652_vm13, %v650_v48, %v651_v47 }
 0x21e   : > { %v749_v0 = vpop.permute.xlu0 %748  ;;  %v655_v17 = vadd.f32 %v653_v22, %v554_v42 }
 0x21f   : > { %v750_v26 = vrot.slane %v749_v0, 1 }
 0x221   : > { %v752_v25 = vsel %vm3576_vm11, %v749_v0, %v750_v26 }
 0x222   : > { %v754_v10 = vadd.f32 %v752_v25, %v655_v17 }
 0x226   : > { %v1139_v12 = vpop.permute.xlu1 %1138 }
 0x227   : > { %v1140_v44 = vrot.slane %v1139_v12, 7 }
 0x228   : > { %v868_v49 = vpop.permute.xlu0 %867 }
 0x229   : > { %v869_v28 = vrot.slane %v868_v49, 1  ;;  %v1141_v18 = vsel %vm385_vm12, %v1140_v44, %v1139_v12 }
 0x22a   : > { %v1143_v58 = vadd.f32 %v1141_v18, %v1126_v16 }
 0x22b   : > { %v871_v41 = vsel %vm870_vm9, %v868_v49, %v869_v28 }
 0x22c   : > { %v873_v55 = vadd.f32 %v871_v41, %v754_v10 }
 0x232   : > { %v1155_v7 = vpop.permute.xlu1 %1154 }
 0x233   : > { %v1156_v5 = vrot.slane %v1155_v7, 7 }
 0x235   : > { %v1157_v59 = vsel %vm385_vm12, %v1156_v5, %v1155_v7 }
 0x236   : > { %v1159_v62 = vadd.f32 %v1157_v59, %v1143_v58 }
 0x23a   : > { %v980_v14 = vpop.permute.xlu0 %979 }
 0x23b   : > { %v981_v46 = vrot.slane %v980_v14, 1 }
 0x23d   : > { %v983_v8 = vsel %vm982_vm4, %v980_v14, %v981_v46 }
 0x23e   : > { %v1171_v21 = vpop.permute.xlu1 %1170  ;;  %v985_v32 = vadd.f32 %v983_v8, %v873_v55 }
 0x23f   : > { %v1172_v11 = vrot.slane %v1171_v21, 7 }
 0x241   : > { %v1173_v29 = vsel %vm385_vm12, %v1172_v11, %v1171_v21  ;;  %vm3577_vm12 = vmmov %vm3576_vm11 }
 0x242   : > { %v1175_v54 = vadd.f32 %v1173_v29, %v1159_v62 }
 0x244   : > { %v1085_v45 = vpop.permute.xlu0 %1084  ;;  %v1176_v53 = vmul.f32 %v1175_v54, %v443_v4 }
 0x245   : > { %v1086_v30 = vrot.slane %v1085_v45, 1 }
 0x247   : > { %v1088_v50 = vsel %vm1087_vm5, %v1085_v45, %v1086_v30 }
 0x248   : > { %v1090_v36 = vadd.f32 %v1088_v50, %v985_v32 }
 0x24a   : > { %v1177_v31 = vadd.f32 %v1176_v53, %v1090_v36 }
 0x252   : > { %v1263_v33 = vpop.permute.xlu1 %1262 }
 0x253   : > { %v1264_v43 = vrot.slane %v1263_v33, 1 }
 0x255   : > { %v1265_v9 = vsel %vm551_vm6, %v1263_v33, %v1264_v43  ;;  %vm1748_vm6 = vcmask 416768  }
 0x256   : > { %v1267_v19 = vadd.f32 %v1265_v9, %v1177_v31 }
 0x25e   : > { %v1353_v39 = vpop.permute.xlu0 %1352 }
 0x25f   : > { %v1354_v48 = vrot.slane %v1353_v39, 1 }
 0x261   : > { %v1355_v1 = vsel %vm652_vm13, %v1353_v39, %v1354_v48 }
 0x262   : > { %v1357_v20 = vadd.f32 %v1355_v1, %v1267_v19 }
 0x26c   : > { %v1445_v15 = vpop.permute.xlu1 %1444 }
 0x26d   : > { %v1446_v56 = vrot.slane %v1445_v15, 1 }
 0x26f   : > { %v1447_v0 = vsel %vm3577_vm12, %v1445_v15, %v1446_v56 }
 0x270   : > { %v1449_v52 = vadd.f32 %v1447_v0, %v1357_v20 }
 0x274   : > { %v1541_v57 = vpop.permute.xlu0 %1540 }
 0x275   : > { %v1542_v24 = vrot.slane %v1541_v57, 1 }
 0x276   : > { %v1637_v13 = vpop.permute.xlu1 %1636 }
 0x277   : > { %v1543_v63 = vsel %vm870_vm9, %v1541_v57, %v1542_v24  ;;  %v1638_v60 = vrot.slane %v1637_v13, 1 }
 0x278   : > { %v1545_v12 = vadd.f32 %v1543_v63, %v1449_v52 }
 0x279   : > { %v1639_v27 = vsel %vm982_vm4, %v1637_v13, %v1638_v60 }
 0x27a   : > { %v1641_v61 = vadd.f32 %v1639_v27, %v1545_v12 }
 0x27e   : > { %v1733_v2 = vpop.permute.xlu0 %1732 }
 0x27f   : > { %v1734_v49 = vrot.slane %v1733_v2, 1 }
 0x281   : > { %v1735_v3 = vsel %vm1087_vm5, %v1733_v2, %v1734_v49 }
 0x282   : > { %v1737_v51 = vadd.f32 %v1735_v3, %v1641_v61 }
 0x284   : > { %v1981_v38 = vmul.f32 -1.442695, %v1737_v51 }
 0x286   : > { %2107 = vpow2.f32 %v1981_v38 }
 0x290   : > { %v2108_v34 = vpop.eup %2107 }
 0x291   : > { %v1741_v7 = vadd.f32 1.0, %v2108_v34 }
 0x293   : > { %2109 = vrcp.f32 %v1741_v7 }
 0x29d   : > { %v2110_v4 = vpop.eup %2109 }
 0x29e   : > { %1745 = vrot.lane.b32.xlu1 %v2110_v4, %s2312_s8 }
 0x310   : > { %v1746_v47 = vpop.permute.xlu1 %1745 }
 0x311   : > { %v1747_v35 = vrot.slane %v1746_v47, 1 }
 0x313   : > { %v1749_v14 = vsel %vm1748_vm6, %v1746_v47, %v1747_v35 }
 0x314   : > { %1751 = vst.msk [vmem:[%s229_s27] sm:$0x3] %vm2516_vm1, %v1749_v14 }
 0x315   : > { %2200 = shalt.err (!%p2197_p11)
}
 0x316   : > { %s2201_s24 = scalar_lea.hbm %s3434_s29, 32  ;;  %s2205_s6 = scalar_lea.hbm %s3488_s3, 64 }
 0x317   : > { %p2202_p7 = scmp.ne.s32.totalorder %s3434_s29, %s2201_s24  ;;  %p2206_p4 = scmp.lt.u32.totalorder %s3434_s29, %s3488_s3 }
 0x318   : > { %p2207_p9 = scmp.lt.u32.totalorder %s2205_s6, %s2201_s24  ;;  %p2209_p8 = scmp.lt.u32.totalorder %s2201_s24, %s3434_s29 }
 0x319   : > { %p2203_p12 = pnand %p2202_p7, %p3578_p2 }
 0x31a   : > { %p2208_p5 = por %p2207_p9, %p2206_p4 }
 0x31b   : > { %p2204_p1 = pneg %p2203_p12 }
 0x31c   : > { %p2210_p10 = por %p2209_p8, %p2208_p5 }
 0x31e   : > { %p2211_p13 = pnand %p2210_p10, %p2204_p1 }
 0x320   : > { %2214 = shalt.err (!%p2211_p13)
}
 0x321   : > { %1999 = dma.vmem_to_hbm [thread:$0]  (%p3578_p2), %s3436_s11, 32, %s3434_s29, %s1753_s15  }
 0x322 PF: > { %s1779_s1 = sand.u32 1, %s2257_s12   ;;  %p3579_p0 = scmp.ne.s32.totalorder %s3528_s23, 0 }
 0x323   : > { %p3580_p6 = scmp.ge.s32.totalorder %s2277_s17, 2  ;;  %s1780_s8 = scalar_lea.sflag [#allocation7], %s1779_s1 }
 0x325   : > { %p2013_p3 = pnand %p3580_p6, %p3579_p0 }
 0x327   : > { %2252 = dma.done.wait (!%p2013_p3), %s1780_s8, 32  }
 0x328   : > { %2254 = vsyncadd (!%p2013_p3), %s1780_s8, 4294967264  ;;  %s21_s17 = sadd.s32 1, %s2277_s17   ;;  %s3581_s12 = smov %s2261_s13 }
 0x329   : > { %p18_p11 = scmp.ge.s32.totalorder %s21_s17, 4   ;;  %s3582_s13 = smov %s2265_s14 }
 0x32a   : > { %s3583_s14 = smov %s2457_s7  ;;  %s3584_s15 = smov %s2273_s16 }
 0x32b   : > { %s3585_s16 = smov %s3587_s26  ;;  %20 = sbr.rel (!%p18_p11) target bundleno = 11 (0xb), region = 97 }
 0x332   :  { %1785 = vsyncpa [#allocation6], 1 }
 0x333   :  { %1787 = vsyncpa [#allocation6 + $0x1], 1 }
 0x334   :  { %1788 = vsyncpa [#allocation11], 1 }
 0x335   :  { %1789 = vsyncpa [#allocation7], 1 }
 0x336   :  { %1791 = vsyncpa [#allocation7 + $0x1], 1 }
 0x337   :  { %1792 = vsyncpa [#allocation8], 1 }
 0x338   :  { %1794 = vsyncpa [#allocation8 + $0x1], 1 }

</bundles_post_ra>
